<compile_context>
chip_gen: v5e
topology: v5e:2x2
jax: 0.10.0
libtpu: 0.0.40
codegen_flags: <defaults>
</compile_context>

<pallas_src>
import jax
import jax.numpy as jnp
from jax import lax
from jax.experimental import pallas as pl
from jax.experimental.pallas import tpu as pltpu

# Whole-array-in-VMEM spec (all tensors at demo sizes are KB-scale; no grid).
VMEM_SPEC = pl.BlockSpec(memory_space=pltpu.MemorySpace.VMEM)


# ----------------------------- fused kernel -------------------------------- #
def _fused_forward_kernel(vid_x_ref, qa_emb_ref, mask_ref,
                          vid_w_ref, vid_b_ref, q_wih_ref, q_b_ref, w_ext_ref,
                          w1v_ref, w1q_ref, w1a_ref, b1_ref, w2_ref, b2_ref,
                          out_ref, proj_ref):
    T, B, Dv = vid_x_ref.shape          # time-major video features
    _, B2, Dw = qa_emb_ref.shape        # time-major [question; answer] embeds
    B3 = B + B2                         # 3B stacked rows: vid | ques | ans
    H = w_ext_ref.shape[0] // 2
    G = 4 * H

    # --- input projections: one big MXU pass per encoder (bf16 x bf16 -> f32),
    #     written time-major into the shared VMEM scratch ---------------------
    vid_proj = (jnp.dot(vid_x_ref[...].reshape(T * B, Dv), vid_w_ref[...],
                        preferred_element_type=jnp.float32)
                + vid_b_ref[...]).reshape(T, B, G)
    qa_proj = (jnp.dot(qa_emb_ref[...].reshape(T * B2, Dw), q_wih_ref[...],
                       preferred_element_type=jnp.float32)
               + q_b_ref[...]).reshape(T, B2, G)
    proj_ref[:, 0:B, :] = vid_proj
    proj_ref[:, B:B3, :] = qa_proj

    # --- fused recurrence: vid + question + answer share ONE time loop -------
    w_ext = w_ext_ref[...]                                    # [2H, 4H] f32
    row = lax.broadcasted_iota(jnp.int32, (B3, 1), 0)
    vid_rows = (row < B).astype(jnp.float32)                  # [3B, 1], hoisted
    qa_rows = 1.0 - vid_rows

    h = jnp.zeros((B3, H), jnp.float32)
    c = jnp.zeros((B3, H), jnp.float32)
    # Fully unrolled static time loop (T is small here); h/c stay in vregs.
    for t in range(T):
        x_t = proj_ref[t]                                     # [3B, 4H] aligned
        # Stacked hidden: vid rows occupy cols 0:H (hit vid_Whh rows of W_ext),
        # q/a rows occupy cols H:2H (hit ques_Whh rows) -> ONE MXU push/step.
        h_ext = jnp.concatenate([h * vid_rows, h * qa_rows], axis=-1)
        gates = x_t + jnp.dot(h_ext, w_ext, preferred_element_type=jnp.float32)
        # Gate columns pre-permuted to (i, f, o | g): contiguous sigmoid slab
        # + contiguous tanh slab (no dual-activation + lane select).
        sig = jax.nn.sigmoid(gates[:, :3 * H])
        g = jnp.tanh(gates[:, 3 * H:])
        i = sig[:, 0 * H:1 * H]
        f = sig[:, 1 * H:2 * H]
        o = sig[:, 2 * H:3 * H]
        c_new = f * c + i * g
        h_new = o * jnp.tanh(c_new)
        # pack_padded_sequence final-hidden semantics: freeze once t >= len.
        keep = mask_ref[t] != 0.0                             # [3B, 1]
        h = jnp.where(keep, h_new, h)
        c = jnp.where(keep, c_new, c)

    # --- MLP head: W1 pre-split into three HxH blocks (no lane concat) -------
    vid_h = h[0:B]
    q_h = h[B:2 * B]
    a_h = h[2 * B:B3]
    hid = jnp.maximum(
        jnp.dot(vid_h, w1v_ref[...], preferred_element_type=jnp.float32)
        + jnp.dot(q_h, w1q_ref[...], preferred_element_type=jnp.float32)
        + jnp.dot(a_h, w1a_ref[...], preferred_element_type=jnp.float32)
        + b1_ref[...], 0.0)
    logits = (jnp.dot(hid, w2_ref[...], preferred_element_type=jnp.float32)
              + b2_ref[...])                                  # [B, 1]
    out_ref[...] = jnp.concatenate([logits, jax.nn.sigmoid(logits)], axis=-1)


# ------------------------- parameters & forward ---------------------------- #
def init_params(key, dim_vid, dim_hidden, vocab_size, dim_word):
    H = dim_hidden
    s = 0.05
    ks = jax.random.split(key, 8)
    return dict(
        embedding=jax.random.normal(ks[0], (vocab_size, dim_word)) * s,
        vid2hid_w=jax.random.normal(ks[1], (dim_vid, H)) * s,
        vid2hid_b=jnp.zeros((1, H), jnp.float32),
        vid_w_ih=jax.random.normal(ks[2], (H, 4 * H)) * s,
        vid_w_hh=jax.random.normal(ks[3], (H, 4 * H)) * s,
        vid_b=jnp.zeros((1, 4 * H), jnp.float32),       # = b_ih + b_hh summed
        ques_w_ih=jax.random.normal(ks[4], (dim_word, 4 * H)) * s,
        ques_w_hh=jax.random.normal(ks[5], (H, 4 * H)) * s,
        ques_b=jnp.zeros((1, 4 * H), jnp.float32),      # = b_ih + b_hh summed
        mlp_w1=jax.random.normal(ks[6], (3 * H, H)) * s,
        mlp_b1=jnp.zeros((1, H), jnp.float32),
        mlp_w2=jax.random.normal(ks[7], (H, 1)) * s,
        mlp_b2=jnp.zeros((1, 1), jnp.float32),
    )


def resnet_lstm_forward(params, vid_feats, question, question_len,
                        answer, answer_len):
    B, Tv, Dv = vid_feats.shape
    Tq = question.shape[1]
    Ta = answer.shape[1]
    H = params["vid_w_hh"].shape[0]
    T = max(Tv, Tq, Ta)                 # common (padded) recurrence length

    # Permute LSTM gate columns from PyTorch (i,f,g,o) to (i,f,o,g): the three
    # sigmoid gates become one contiguous slab, tanh gate is the last slab.
    def perm_gates(w):
        return jnp.concatenate(
            [w[..., :2 * H], w[..., 3 * H:], w[..., 2 * H:3 * H]], axis=-1)

    # Fold Linear(dim_vid->H) into the vid-LSTM input projection (exact — no
    # nonlinearity between them); permute gates; cast matmul operands to bf16.
    vid_w_f = perm_gates(params["vid2hid_w"] @ params["vid_w_ih"])
    vid_b_f = perm_gates(params["vid2hid_b"] @ params["vid_w_ih"]
                         + params["vid_b"])                        # f32 [1,4H]
    q_wih = perm_gates(params["ques_w_ih"]).astype(jnp.bfloat16)   # [Dw,4H]
    q_b = perm_gates(params["ques_b"])                             # f32 [1,4H]
    vid_w_f = vid_w_f.astype(jnp.bfloat16)                         # [Dv,4H]

    # Stacked recurrent weight for the fused (vid | ques | ans) time loop.
    w_ext = jnp.concatenate([perm_gates(params["vid_w_hh"]),
                             perm_gates(params["ques_w_hh"])], axis=0)  # [2H,4H]

    # MLP first layer split into three HxH blocks (replaces the lane concat).
    w1v = params["mlp_w1"][0:H]
    w1q = params["mlp_w1"][H:2 * H]
    w1a = params["mlp_w1"][2 * H:3 * H]

    # Inputs: time-major, padded to the common T (question/answer padded
    # independently, so different padded lengths are handled correctly).
    vid_x = jnp.transpose(vid_feats.astype(jnp.float32), (1, 0, 2))  # [Tv,B,Dv]
    if Tv < T:
        vid_x = jnp.pad(vid_x, ((0, T - Tv), (0, 0), (0, 0)))
    q_emb = jnp.take(params["embedding"], question.T, axis=0)       # [Tq,B,Dw]
    a_emb = jnp.take(params["embedding"], answer.T, axis=0)         # [Ta,B,Dw]
    if Tq < T:
        q_emb = jnp.pad(q_emb, ((0, T - Tq), (0, 0), (0, 0)))
    if Ta < T:
        a_emb = jnp.pad(a_emb, ((0, T - Ta), (0, 0), (0, 0)))
    qa_emb = jnp.concatenate([q_emb, a_emb], axis=1)                # [T,2B,Dw]
    vid_x = vid_x.astype(jnp.bfloat16)
    qa_emb = qa_emb.astype(jnp.bfloat16)

    # Length/freeze mask, precomputed once: [T, 3B, 1] (vid rows always full).
    lens = jnp.concatenate([jnp.full((B,), Tv, jnp.int32),
                            question_len.astype(jnp.int32),
                            answer_len.astype(jnp.int32)], axis=0)  # [3B]
    step_mask = (jnp.arange(T, dtype=jnp.int32)[:, None]
                 < lens[None, :]).astype(jnp.float32)[..., None]    # [T,3B,1]

    out = pl.pallas_call(
        _fused_forward_kernel,
        out_shape=jax.ShapeDtypeStruct((B, 2), jnp.float32),
        in_specs=[VMEM_SPEC] * 14,
        out_specs=VMEM_SPEC,
        scratch_shapes=[pltpu.VMEM((T, 3 * B, 4 * H), jnp.float32)],
    )(vid_x, qa_emb, step_mask,
      vid_w_f, vid_b_f, q_wih, q_b, w_ext,
      w1v, w1q, w1a, params["mlp_b1"], params["mlp_w2"], params["mlp_b2"])

    # torch.squeeze(logits): [1, B, 1] -> [B]
    return out[:, 0], out[:, 1]


if __name__ == "__main__":
    # Small shapes consistent with the module (scaled-down fake inputs).
    B, T_vid, DIM_VID, H, DIM_WORD, VOCAB, T_SEQ = 8, 8, 64, 32, 32, 64, 8

    key = jax.random.PRNGKey(0)
    pkey, dkey = jax.random.split(key)
    params = init_params(pkey, DIM_VID, H, VOCAB, DIM_WORD)

    k1, k2, k3 = jax.random.split(dkey, 3)
    vid_feats = jax.random.normal(k1, (B, T_vid, DIM_VID), jnp.float32)
    question = jax.random.randint(k2, (B, T_SEQ), 0, VOCAB, jnp.int32)
    answer = jax.random.randint(k3, (B, T_SEQ), 0, VOCAB, jnp.int32)
    question_len = jnp.full((B,), T_SEQ, jnp.int32)
    answer_len = jnp.full((B,), T_SEQ, jnp.int32)

    logits, probs = jax.jit(resnet_lstm_forward)(
        params, vid_feats, question, question_len, answer, answer_len)
    jax.block_until_ready((logits, probs))

    assert logits.shape == (B,) and probs.shape == (B,)
    assert bool(jnp.all(jnp.isfinite(logits)))
    assert bool(jnp.all((probs >= 0.0) & (probs <= 1.0)))
    print("KERNEL_OK")
</pallas_src>

<mosaic_0001>
module attributes {stable_mosaic.version = 11 : i64} {
  func.func @_fused_forward_kernel(%arg0: memref<8x8x64xbf16, #tpu.memory_space<vmem>>, %arg1: memref<8x16x32xbf16, #tpu.memory_space<vmem>>, %arg2: memref<8x24x1xf32, #tpu.memory_space<vmem>>, %arg3: memref<64x128xbf16, #tpu.memory_space<vmem>>, %arg4: memref<1x128xf32, #tpu.memory_space<vmem>>, %arg5: memref<32x128xbf16, #tpu.memory_space<vmem>>, %arg6: memref<1x128xf32, #tpu.memory_space<vmem>>, %arg7: memref<64x128xf32, #tpu.memory_space<vmem>>, %arg8: memref<32x32xf32, #tpu.memory_space<vmem>>, %arg9: memref<32x32xf32, #tpu.memory_space<vmem>>, %arg10: memref<32x32xf32, #tpu.memory_space<vmem>>, %arg11: memref<1x32xf32, #tpu.memory_space<vmem>>, %arg12: memref<32x1xf32, #tpu.memory_space<vmem>>, %arg13: memref<1x1xf32, #tpu.memory_space<vmem>>, %arg14: memref<8x2xf32, #tpu.memory_space<vmem>>, %arg15: memref<8x24x128xf32, #tpu.memory_space<vmem>>) attributes {dimension_semantics = [], scalar_prefetch = 0 : i64, scratch_operands = 1 : i64, tpu.core_type = #tpu.core_type<tc>} {
    %c0 = arith.constant 0 : index
    %c0_0 = arith.constant 0 : index
    %c0_1 = arith.constant 0 : index
    %0 = vector.load %arg0[%c0, %c0_0, %c0_1] : memref<8x8x64xbf16, #tpu.memory_space<vmem>>, vector<8x8x64xbf16>
    %1 = vector.shape_cast %0 : vector<8x8x64xbf16> to vector<64x64xbf16>
    %c0_2 = arith.constant 0 : index
    %c0_3 = arith.constant 0 : index
    %2 = vector.load %arg3[%c0_2, %c0_3] : memref<64x128xbf16, #tpu.memory_space<vmem>>, vector<64x128xbf16>
    %cst = arith.constant dense<0.000000e+00> : vector<64x128xf32>
    %3 = tpu.matmul %1, %2, %cst {dimension_numbers = #tpu.dot_dimension_numbers<[1], [0], [0], [1], [0, 0, 1, 1], [], []>} : vector<64x64xbf16>, vector<64x128xbf16>, vector<64x128xf32> -> vector<64x128xf32>
    %c0_4 = arith.constant 0 : index
    %c0_5 = arith.constant 0 : index
    %4 = vector.load %arg4[%c0_4, %c0_5] : memref<1x128xf32, #tpu.memory_space<vmem>>, vector<1x128xf32>
    %5 = vector.broadcast %4 : vector<1x128xf32> to vector<64x128xf32>
    %6 = arith.addf %3, %5 : vector<64x128xf32>
    %7 = vector.shape_cast %6 : vector<64x128xf32> to vector<8x8x128xf32>
    %c0_6 = arith.constant 0 : index
    %c0_7 = arith.constant 0 : index
    %c0_8 = arith.constant 0 : index
    %8 = vector.load %arg1[%c0_6, %c0_7, %c0_8] : memref<8x16x32xbf16, #tpu.memory_space<vmem>>, vector<8x16x32xbf16>
    %9 = vector.shape_cast %8 : vector<8x16x32xbf16> to vector<128x32xbf16>
    %c0_9 = arith.constant 0 : index
    %c0_10 = arith.constant 0 : index
    %10 = vector.load %arg5[%c0_9, %c0_10] : memref<32x128xbf16, #tpu.memory_space<vmem>>, vector<32x128xbf16>
    %cst_11 = arith.constant dense<0.000000e+00> : vector<128x128xf32>
    %11 = tpu.matmul %9, %10, %cst_11 {dimension_numbers = #tpu.dot_dimension_numbers<[1], [0], [0], [1], [0, 0, 1, 1], [], []>} : vector<128x32xbf16>, vector<32x128xbf16>, vector<128x128xf32> -> vector<128x128xf32>
    %c0_12 = arith.constant 0 : index
    %c0_13 = arith.constant 0 : index
    %12 = vector.load %arg6[%c0_12, %c0_13] : memref<1x128xf32, #tpu.memory_space<vmem>>, vector<1x128xf32>
    %13 = vector.broadcast %12 : vector<1x128xf32> to vector<128x128xf32>
    %14 = arith.addf %11, %13 : vector<128x128xf32>
    %15 = vector.shape_cast %14 : vector<128x128xf32> to vector<8x16x128xf32>
    %c0_14 = arith.constant 0 : index
    %c0_15 = arith.constant 0 : index
    %c0_16 = arith.constant 0 : index
    %16 = vector.load %arg15[%c0_14, %c0_15, %c0_16] : memref<8x24x128xf32, #tpu.memory_space<vmem>>, vector<8x8x128xf32>
    tpu.vector_store %arg15[%c0_14, %c0_15, %c0_16], %7 {strides = array<i32>} : memref<8x24x128xf32, #tpu.memory_space<vmem>>, vector<8x8x128xf32>,
    %c0_17 = arith.constant 0 : index
    %c8 = arith.constant 8 : index
    %c0_18 = arith.constant 0 : index
    %17 = vector.load %arg15[%c0_17, %c8, %c0_18] : memref<8x24x128xf32, #tpu.memory_space<vmem>>, vector<8x16x128xf32>
    tpu.vector_store %arg15[%c0_17, %c8, %c0_18], %15 {strides = array<i32>} : memref<8x24x128xf32, #tpu.memory_space<vmem>>, vector<8x16x128xf32>,
    %c0_19 = arith.constant 0 : index
    %c0_20 = arith.constant 0 : index
    %18 = vector.load %arg7[%c0_19, %c0_20] : memref<64x128xf32, #tpu.memory_space<vmem>>, vector<64x128xf32>
    %19 = tpu.iota {dimensions = array<i32: 0>} : vector<24x1xi32>
    %c8_i32 = arith.constant 8 : i32
    %20 = vector.broadcast %c8_i32 : i32 to vector<24x1xi32>
    %21 = arith.cmpi slt, %19, %20 : vector<24x1xi32>
    %22 = arith.extui %21 : vector<24x1xi1> to vector<24x1xi32>
    %23 = arith.sitofp %22 : vector<24x1xi32> to vector<24x1xf32>
    %cst_21 = arith.constant 1.000000e+00 : f32
    %24 = vector.broadcast %cst_21 : f32 to vector<24x1xf32>
    %25 = arith.subf %24, %23 : vector<24x1xf32>
    %cst_22 = arith.constant 0.000000e+00 : f32
    %26 = vector.broadcast %cst_22 : f32 to vector<24x32xf32>
    %cst_23 = arith.constant 0.000000e+00 : f32
    %27 = vector.broadcast %cst_23 : f32 to vector<24x32xf32>
    %c0_24 = arith.constant 0 : index
    %c0_25 = arith.constant 0 : index
    %c0_26 = arith.constant 0 : index
    %28 = vector.load %arg15[%c0_24, %c0_25, %c0_26] : memref<8x24x128xf32, #tpu.memory_space<vmem>>, vector<1x24x128xf32>
    %29 = vector.shape_cast %28 : vector<1x24x128xf32> to vector<24x128xf32>
    %30 = vector.broadcast %23 : vector<24x1xf32> to vector<24x32xf32>
    %31 = arith.mulf %26, %30 : vector<24x32xf32>
    %32 = vector.broadcast %25 : vector<24x1xf32> to vector<24x32xf32>
    %33 = arith.mulf %26, %32 : vector<24x32xf32>
    %34 = tpu.concatenate %31, %33 in 1 : vector<24x32xf32>, vector<24x32xf32> -> vector<24x64xf32>
    %cst_27 = arith.constant dense<0.000000e+00> : vector<24x128xf32>
    %35 = tpu.matmul %34, %18, %cst_27 {dimension_numbers = #tpu.dot_dimension_numbers<[1], [0], [0], [1], [0, 0, 1, 1], [], []>} : vector<24x64xf32>, vector<64x128xf32>, vector<24x128xf32> -> vector<24x128xf32>
    %36 = arith.addf %29, %35 : vector<24x128xf32>
    %37 = vector.extract_strided_slice %36 {offsets = [0, 0], sizes = [24, 96], strides = [1, 1]} : vector<24x128xf32> to vector<24x96xf32>
    %38 = arith.negf %37 : vector<24x96xf32>
    %39 = math.exp %38 : vector<24x96xf32>
    %cst_28 = arith.constant 1.000000e+00 : f32
    %40 = vector.broadcast %cst_28 : f32 to vector<24x96xf32>
    %41 = arith.addf %40, %39 : vector<24x96xf32>
    %42 = arith.divf %40, %41 : vector<24x96xf32>
    %43 = vector.extract_strided_slice %36 {offsets = [0, 96], sizes = [24, 32], strides = [1, 1]} : vector<24x128xf32> to vector<24x32xf32>
    %44 = math.tanh %43 : vector<24x32xf32>
    %45 = vector.extract_strided_slice %42 {offsets = [0, 0], sizes = [24, 32], strides = [1, 1]} : vector<24x96xf32> to vector<24x32xf32>
    %46 = vector.extract_strided_slice %42 {offsets = [0, 32], sizes = [24, 32], strides = [1, 1]} : vector<24x96xf32> to vector<24x32xf32>
    %47 = vector.extract_strided_slice %42 {offsets = [0, 64], sizes = [24, 32], strides = [1, 1]} : vector<24x96xf32> to vector<24x32xf32>
    %48 = arith.mulf %46, %27 : vector<24x32xf32>
    %49 = arith.mulf %45, %44 : vector<24x32xf32>
    %50 = arith.addf %48, %49 : vector<24x32xf32>
    %51 = math.tanh %50 : vector<24x32xf32>
    %52 = arith.mulf %47, %51 : vector<24x32xf32>
    %c0_29 = arith.constant 0 : index
    %c0_30 = arith.constant 0 : index
    %c0_31 = arith.constant 0 : index
    %53 = vector.load %arg2[%c0_29, %c0_30, %c0_31] : memref<8x24x1xf32, #tpu.memory_space<vmem>>, vector<1x24x1xf32>
    %54 = vector.shape_cast %53 : vector<1x24x1xf32> to vector<24x1xf32>
    %cst_32 = arith.constant 0.000000e+00 : f32
    %55 = vector.broadcast %cst_32 : f32 to vector<24x1xf32>
    %56 = arith.cmpf one, %54, %55 : vector<24x1xf32>
    %57 = vector.shape_cast %56 : vector<24x1xi1> to vector<24x1xi1>
    %58 = vector.broadcast %57 : vector<24x1xi1> to vector<24x32xi1>
    %59 = arith.select %58, %52, %26 : vector<24x32xi1>, vector<24x32xf32>
    %60 = vector.shape_cast %56 : vector<24x1xi1> to vector<24x1xi1>
    %61 = vector.broadcast %60 : vector<24x1xi1> to vector<24x32xi1>
    %62 = arith.select %61, %50, %27 : vector<24x32xi1>, vector<24x32xf32>
    %c1 = arith.constant 1 : index
    %c0_33 = arith.constant 0 : index
    %c0_34 = arith.constant 0 : index
    %63 = vector.load %arg15[%c1, %c0_33, %c0_34] : memref<8x24x128xf32, #tpu.memory_space<vmem>>, vector<1x24x128xf32>
    %64 = vector.shape_cast %63 : vector<1x24x128xf32> to vector<24x128xf32>
    %65 = vector.broadcast %23 : vector<24x1xf32> to vector<24x32xf32>
    %66 = arith.mulf %59, %65 : vector<24x32xf32>
    %67 = vector.broadcast %25 : vector<24x1xf32> to vector<24x32xf32>
    %68 = arith.mulf %59, %67 : vector<24x32xf32>
    %69 = tpu.concatenate %66, %68 in 1 : vector<24x32xf32>, vector<24x32xf32> -> vector<24x64xf32>
    %cst_35 = arith.constant dense<0.000000e+00> : vector<24x128xf32>
    %70 = tpu.matmul %69, %18, %cst_35 {dimension_numbers = #tpu.dot_dimension_numbers<[1], [0], [0], [1], [0, 0, 1, 1], [], []>} : vector<24x64xf32>, vector<64x128xf32>, vector<24x128xf32> -> vector<24x128xf32>
    %71 = arith.addf %64, %70 : vector<24x128xf32>
    %72 = vector.extract_strided_slice %71 {offsets = [0, 0], sizes = [24, 96], strides = [1, 1]} : vector<24x128xf32> to vector<24x96xf32>
    %73 = arith.negf %72 : vector<24x96xf32>
    %74 = math.exp %73 : vector<24x96xf32>
    %cst_36 = arith.constant 1.000000e+00 : f32
    %75 = vector.broadcast %cst_36 : f32 to vector<24x96xf32>
    %76 = arith.addf %75, %74 : vector<24x96xf32>
    %77 = arith.divf %75, %76 : vector<24x96xf32>
    %78 = vector.extract_strided_slice %71 {offsets = [0, 96], sizes = [24, 32], strides = [1, 1]} : vector<24x128xf32> to vector<24x32xf32>
    %79 = math.tanh %78 : vector<24x32xf32>
    %80 = vector.extract_strided_slice %77 {offsets = [0, 0], sizes = [24, 32], strides = [1, 1]} : vector<24x96xf32> to vector<24x32xf32>
    %81 = vector.extract_strided_slice %77 {offsets = [0, 32], sizes = [24, 32], strides = [1, 1]} : vector<24x96xf32> to vector<24x32xf32>
    %82 = vector.extract_strided_slice %77 {offsets = [0, 64], sizes = [24, 32], strides = [1, 1]} : vector<24x96xf32> to vector<24x32xf32>
    %83 = arith.mulf %81, %62 : vector<24x32xf32>
    %84 = arith.mulf %80, %79 : vector<24x32xf32>
    %85 = arith.addf %83, %84 : vector<24x32xf32>
    %86 = math.tanh %85 : vector<24x32xf32>
    %87 = arith.mulf %82, %86 : vector<24x32xf32>
    %c1_37 = arith.constant 1 : index
    %c0_38 = arith.constant 0 : index
    %c0_39 = arith.constant 0 : index
    %88 = vector.load %arg2[%c1_37, %c0_38, %c0_39] : memref<8x24x1xf32, #tpu.memory_space<vmem>>, vector<1x24x1xf32>
    %89 = vector.shape_cast %88 : vector<1x24x1xf32> to vector<24x1xf32>
    %cst_40 = arith.constant 0.000000e+00 : f32
    %90 = vector.broadcast %cst_40 : f32 to vector<24x1xf32>
    %91 = arith.cmpf one, %89, %90 : vector<24x1xf32>
    %92 = vector.shape_cast %91 : vector<24x1xi1> to vector<24x1xi1>
    %93 = vector.broadcast %92 : vector<24x1xi1> to vector<24x32xi1>
    %94 = arith.select %93, %87, %59 : vector<24x32xi1>, vector<24x32xf32>
    %95 = vector.shape_cast %91 : vector<24x1xi1> to vector<24x1xi1>
    %96 = vector.broadcast %95 : vector<24x1xi1> to vector<24x32xi1>
    %97 = arith.select %96, %85, %62 : vector<24x32xi1>, vector<24x32xf32>
    %c2 = arith.constant 2 : index
    %c0_41 = arith.constant 0 : index
    %c0_42 = arith.constant 0 : index
    %98 = vector.load %arg15[%c2, %c0_41, %c0_42] : memref<8x24x128xf32, #tpu.memory_space<vmem>>, vector<1x24x128xf32>
    %99 = vector.shape_cast %98 : vector<1x24x128xf32> to vector<24x128xf32>
    %100 = vector.broadcast %23 : vector<24x1xf32> to vector<24x32xf32>
    %101 = arith.mulf %94, %100 : vector<24x32xf32>
    %102 = vector.broadcast %25 : vector<24x1xf32> to vector<24x32xf32>
    %103 = arith.mulf %94, %102 : vector<24x32xf32>
    %104 = tpu.concatenate %101, %103 in 1 : vector<24x32xf32>, vector<24x32xf32> -> vector<24x64xf32>
    %cst_43 = arith.constant dense<0.000000e+00> : vector<24x128xf32>
    %105 = tpu.matmul %104, %18, %cst_43 {dimension_numbers = #tpu.dot_dimension_numbers<[1], [0], [0], [1], [0, 0, 1, 1], [], []>} : vector<24x64xf32>, vector<64x128xf32>, vector<24x128xf32> -> vector<24x128xf32>
    %106 = arith.addf %99, %105 : vector<24x128xf32>
    %107 = vector.extract_strided_slice %106 {offsets = [0, 0], sizes = [24, 96], strides = [1, 1]} : vector<24x128xf32> to vector<24x96xf32>
    %108 = arith.negf %107 : vector<24x96xf32>
    %109 = math.exp %108 : vector<24x96xf32>
    %cst_44 = arith.constant 1.000000e+00 : f32
    %110 = vector.broadcast %cst_44 : f32 to vector<24x96xf32>
    %111 = arith.addf %110, %109 : vector<24x96xf32>
    %112 = arith.divf %110, %111 : vector<24x96xf32>
    %113 = vector.extract_strided_slice %106 {offsets = [0, 96], sizes = [24, 32], strides = [1, 1]} : vector<24x128xf32> to vector<24x32xf32>
    %114 = math.tanh %113 : vector<24x32xf32>
    %115 = vector.extract_strided_slice %112 {offsets = [0, 0], sizes = [24, 32], strides = [1, 1]} : vector<24x96xf32> to vector<24x32xf32>
    %116 = vector.extract_strided_slice %112 {offsets = [0, 32], sizes = [24, 32], strides = [1, 1]} : vector<24x96xf32> to vector<24x32xf32>
    %117 = vector.extract_strided_slice %112 {offsets = [0, 64], sizes = [24, 32], strides = [1, 1]} : vector<24x96xf32> to vector<24x32xf32>
    %118 = arith.mulf %116, %97 : vector<24x32xf32>
    %119 = arith.mulf %115, %114 : vector<24x32xf32>
    %120 = arith.addf %118, %119 : vector<24x32xf32>
    %121 = math.tanh %120 : vector<24x32xf32>
    %122 = arith.mulf %117, %121 : vector<24x32xf32>
    %c2_45 = arith.constant 2 : index
    %c0_46 = arith.constant 0 : index
    %c0_47 = arith.constant 0 : index
    %123 = vector.load %arg2[%c2_45, %c0_46, %c0_47] : memref<8x24x1xf32, #tpu.memory_space<vmem>>, vector<1x24x1xf32>
    %124 = vector.shape_cast %123 : vector<1x24x1xf32> to vector<24x1xf32>
    %cst_48 = arith.constant 0.000000e+00 : f32
    %125 = vector.broadcast %cst_48 : f32 to vector<24x1xf32>
    %126 = arith.cmpf one, %124, %125 : vector<24x1xf32>
    %127 = vector.shape_cast %126 : vector<24x1xi1> to vector<24x1xi1>
    %128 = vector.broadcast %127 : vector<24x1xi1> to vector<24x32xi1>
    %129 = arith.select %128, %122, %94 : vector<24x32xi1>, vector<24x32xf32>
    %130 = vector.shape_cast %126 : vector<24x1xi1> to vector<24x1xi1>
    %131 = vector.broadcast %130 : vector<24x1xi1> to vector<24x32xi1>
    %132 = arith.select %131, %120, %97 : vector<24x32xi1>, vector<24x32xf32>
    %c3 = arith.constant 3 : index
    %c0_49 = arith.constant 0 : index
    %c0_50 = arith.constant 0 : index
    %133 = vector.load %arg15[%c3, %c0_49, %c0_50] : memref<8x24x128xf32, #tpu.memory_space<vmem>>, vector<1x24x128xf32>
    %134 = vector.shape_cast %133 : vector<1x24x128xf32> to vector<24x128xf32>
    %135 = vector.broadcast %23 : vector<24x1xf32> to vector<24x32xf32>
    %136 = arith.mulf %129, %135 : vector<24x32xf32>
    %137 = vector.broadcast %25 : vector<24x1xf32> to vector<24x32xf32>
    %138 = arith.mulf %129, %137 : vector<24x32xf32>
    %139 = tpu.concatenate %136, %138 in 1 : vector<24x32xf32>, vector<24x32xf32> -> vector<24x64xf32>
    %cst_51 = arith.constant dense<0.000000e+00> : vector<24x128xf32>
    %140 = tpu.matmul %139, %18, %cst_51 {dimension_numbers = #tpu.dot_dimension_numbers<[1], [0], [0], [1], [0, 0, 1, 1], [], []>} : vector<24x64xf32>, vector<64x128xf32>, vector<24x128xf32> -> vector<24x128xf32>
    %141 = arith.addf %134, %140 : vector<24x128xf32>
    %142 = vector.extract_strided_slice %141 {offsets = [0, 0], sizes = [24, 96], strides = [1, 1]} : vector<24x128xf32> to vector<24x96xf32>
    %143 = arith.negf %142 : vector<24x96xf32>
    %144 = math.exp %143 : vector<24x96xf32>
    %cst_52 = arith.constant 1.000000e+00 : f32
    %145 = vector.broadcast %cst_52 : f32 to vector<24x96xf32>
    %146 = arith.addf %145, %144 : vector<24x96xf32>
    %147 = arith.divf %145, %146 : vector<24x96xf32>
    %148 = vector.extract_strided_slice %141 {offsets = [0, 96], sizes = [24, 32], strides = [1, 1]} : vector<24x128xf32> to vector<24x32xf32>
    %149 = math.tanh %148 : vector<24x32xf32>
    %150 = vector.extract_strided_slice %147 {offsets = [0, 0], sizes = [24, 32], strides = [1, 1]} : vector<24x96xf32> to vector<24x32xf32>
    %151 = vector.extract_strided_slice %147 {offsets = [0, 32], sizes = [24, 32], strides = [1, 1]} : vector<24x96xf32> to vector<24x32xf32>
    %152 = vector.extract_strided_slice %147 {offsets = [0, 64], sizes = [24, 32], strides = [1, 1]} : vector<24x96xf32> to vector<24x32xf32>
    %153 = arith.mulf %151, %132 : vector<24x32xf32>
    %154 = arith.mulf %150, %149 : vector<24x32xf32>
    %155 = arith.addf %153, %154 : vector<24x32xf32>
    %156 = math.tanh %155 : vector<24x32xf32>
    %157 = arith.mulf %152, %156 : vector<24x32xf32>
    %c3_53 = arith.constant 3 : index
    %c0_54 = arith.constant 0 : index
    %c0_55 = arith.constant 0 : index
    %158 = vector.load %arg2[%c3_53, %c0_54, %c0_55] : memref<8x24x1xf32, #tpu.memory_space<vmem>>, vector<1x24x1xf32>
    %159 = vector.shape_cast %158 : vector<1x24x1xf32> to vector<24x1xf32>
    %cst_56 = arith.constant 0.000000e+00 : f32
    %160 = vector.broadcast %cst_56 : f32 to vector<24x1xf32>
    %161 = arith.cmpf one, %159, %160 : vector<24x1xf32>
    %162 = vector.shape_cast %161 : vector<24x1xi1> to vector<24x1xi1>
    %163 = vector.broadcast %162 : vector<24x1xi1> to vector<24x32xi1>
    %164 = arith.select %163, %157, %129 : vector<24x32xi1>, vector<24x32xf32>
    %165 = vector.shape_cast %161 : vector<24x1xi1> to vector<24x1xi1>
    %166 = vector.broadcast %165 : vector<24x1xi1> to vector<24x32xi1>
    %167 = arith.select %166, %155, %132 : vector<24x32xi1>, vector<24x32xf32>
    %c4 = arith.constant 4 : index
    %c0_57 = arith.constant 0 : index
    %c0_58 = arith.constant 0 : index
    %168 = vector.load %arg15[%c4, %c0_57, %c0_58] : memref<8x24x128xf32, #tpu.memory_space<vmem>>, vector<1x24x128xf32>
    %169 = vector.shape_cast %168 : vector<1x24x128xf32> to vector<24x128xf32>
    %170 = vector.broadcast %23 : vector<24x1xf32> to vector<24x32xf32>
    %171 = arith.mulf %164, %170 : vector<24x32xf32>
    %172 = vector.broadcast %25 : vector<24x1xf32> to vector<24x32xf32>
    %173 = arith.mulf %164, %172 : vector<24x32xf32>
    %174 = tpu.concatenate %171, %173 in 1 : vector<24x32xf32>, vector<24x32xf32> -> vector<24x64xf32>
    %cst_59 = arith.constant dense<0.000000e+00> : vector<24x128xf32>
    %175 = tpu.matmul %174, %18, %cst_59 {dimension_numbers = #tpu.dot_dimension_numbers<[1], [0], [0], [1], [0, 0, 1, 1], [], []>} : vector<24x64xf32>, vector<64x128xf32>, vector<24x128xf32> -> vector<24x128xf32>
    %176 = arith.addf %169, %175 : vector<24x128xf32>
    %177 = vector.extract_strided_slice %176 {offsets = [0, 0], sizes = [24, 96], strides = [1, 1]} : vector<24x128xf32> to vector<24x96xf32>
    %178 = arith.negf %177 : vector<24x96xf32>
    %179 = math.exp %178 : vector<24x96xf32>
    %cst_60 = arith.constant 1.000000e+00 : f32
    %180 = vector.broadcast %cst_60 : f32 to vector<24x96xf32>
    %181 = arith.addf %180, %179 : vector<24x96xf32>
    %182 = arith.divf %180, %181 : vector<24x96xf32>
    %183 = vector.extract_strided_slice %176 {offsets = [0, 96], sizes = [24, 32], strides = [1, 1]} : vector<24x128xf32> to vector<24x32xf32>
    %184 = math.tanh %183 : vector<24x32xf32>
    %185 = vector.extract_strided_slice %182 {offsets = [0, 0], sizes = [24, 32], strides = [1, 1]} : vector<24x96xf32> to vector<24x32xf32>
    %186 = vector.extract_strided_slice %182 {offsets = [0, 32], sizes = [24, 32], strides = [1, 1]} : vector<24x96xf32> to vector<24x32xf32>
    %187 = vector.extract_strided_slice %182 {offsets = [0, 64], sizes = [24, 32], strides = [1, 1]} : vector<24x96xf32> to vector<24x32xf32>
    %188 = arith.mulf %186, %167 : vector<24x32xf32>
    %189 = arith.mulf %185, %184 : vector<24x32xf32>
    %190 = arith.addf %188, %189 : vector<24x32xf32>
    %191 = math.tanh %190 : vector<24x32xf32>
    %192 = arith.mulf %187, %191 : vector<24x32xf32>
    %c4_61 = arith.constant 4 : index
    %c0_62 = arith.constant 0 : index
    %c0_63 = arith.constant 0 : index
    %193 = vector.load %arg2[%c4_61, %c0_62, %c0_63] : memref<8x24x1xf32, #tpu.memory_space<vmem>>, vector<1x24x1xf32>
    %194 = vector.shape_cast %193 : vector<1x24x1xf32> to vector<24x1xf32>
    %cst_64 = arith.constant 0.000000e+00 : f32
    %195 = vector.broadcast %cst_64 : f32 to vector<24x1xf32>
    %196 = arith.cmpf one, %194, %195 : vector<24x1xf32>
    %197 = vector.shape_cast %196 : vector<24x1xi1> to vector<24x1xi1>
    %198 = vector.broadcast %197 : vector<24x1xi1> to vector<24x32xi1>
    %199 = arith.select %198, %192, %164 : vector<24x32xi1>, vector<24x32xf32>
    %200 = vector.shape_cast %196 : vector<24x1xi1> to vector<24x1xi1>
    %201 = vector.broadcast %200 : vector<24x1xi1> to vector<24x32xi1>
    %202 = arith.select %201, %190, %167 : vector<24x32xi1>, vector<24x32xf32>
    %c5 = arith.constant 5 : index
    %c0_65 = arith.constant 0 : index
    %c0_66 = arith.constant 0 : index
    %203 = vector.load %arg15[%c5, %c0_65, %c0_66] : memref<8x24x128xf32, #tpu.memory_space<vmem>>, vector<1x24x128xf32>
    %204 = vector.shape_cast %203 : vector<1x24x128xf32> to vector<24x128xf32>
    %205 = vector.broadcast %23 : vector<24x1xf32> to vector<24x32xf32>
    %206 = arith.mulf %199, %205 : vector<24x32xf32>
    %207 = vector.broadcast %25 : vector<24x1xf32> to vector<24x32xf32>
    %208 = arith.mulf %199, %207 : vector<24x32xf32>
    %209 = tpu.concatenate %206, %208 in 1 : vector<24x32xf32>, vector<24x32xf32> -> vector<24x64xf32>
    %cst_67 = arith.constant dense<0.000000e+00> : vector<24x128xf32>
    %210 = tpu.matmul %209, %18, %cst_67 {dimension_numbers = #tpu.dot_dimension_numbers<[1], [0], [0], [1], [0, 0, 1, 1], [], []>} : vector<24x64xf32>, vector<64x128xf32>, vector<24x128xf32> -> vector<24x128xf32>
    %211 = arith.addf %204, %210 : vector<24x128xf32>
    %212 = vector.extract_strided_slice %211 {offsets = [0, 0], sizes = [24, 96], strides = [1, 1]} : vector<24x128xf32> to vector<24x96xf32>
    %213 = arith.negf %212 : vector<24x96xf32>
    %214 = math.exp %213 : vector<24x96xf32>
    %cst_68 = arith.constant 1.000000e+00 : f32
    %215 = vector.broadcast %cst_68 : f32 to vector<24x96xf32>
    %216 = arith.addf %215, %214 : vector<24x96xf32>
    %217 = arith.divf %215, %216 : vector<24x96xf32>
    %218 = vector.extract_strided_slice %211 {offsets = [0, 96], sizes = [24, 32], strides = [1, 1]} : vector<24x128xf32> to vector<24x32xf32>
    %219 = math.tanh %218 : vector<24x32xf32>
    %220 = vector.extract_strided_slice %217 {offsets = [0, 0], sizes = [24, 32], strides = [1, 1]} : vector<24x96xf32> to vector<24x32xf32>
    %221 = vector.extract_strided_slice %217 {offsets = [0, 32], sizes = [24, 32], strides = [1, 1]} : vector<24x96xf32> to vector<24x32xf32>
    %222 = vector.extract_strided_slice %217 {offsets = [0, 64], sizes = [24, 32], strides = [1, 1]} : vector<24x96xf32> to vector<24x32xf32>
    %223 = arith.mulf %221, %202 : vector<24x32xf32>
    %224 = arith.mulf %220, %219 : vector<24x32xf32>
    %225 = arith.addf %223, %224 : vector<24x32xf32>
    %226 = math.tanh %225 : vector<24x32xf32>
    %227 = arith.mulf %222, %226 : vector<24x32xf32>
    %c5_69 = arith.constant 5 : index
    %c0_70 = arith.constant 0 : index
    %c0_71 = arith.constant 0 : index
    %228 = vector.load %arg2[%c5_69, %c0_70, %c0_71] : memref<8x24x1xf32, #tpu.memory_space<vmem>>, vector<1x24x1xf32>
    %229 = vector.shape_cast %228 : vector<1x24x1xf32> to vector<24x1xf32>
    %cst_72 = arith.constant 0.000000e+00 : f32
    %230 = vector.broadcast %cst_72 : f32 to vector<24x1xf32>
    %231 = arith.cmpf one, %229, %230 : vector<24x1xf32>
    %232 = vector.shape_cast %231 : vector<24x1xi1> to vector<24x1xi1>
    %233 = vector.broadcast %232 : vector<24x1xi1> to vector<24x32xi1>
    %234 = arith.select %233, %227, %199 : vector<24x32xi1>, vector<24x32xf32>
    %235 = vector.shape_cast %231 : vector<24x1xi1> to vector<24x1xi1>
    %236 = vector.broadcast %235 : vector<24x1xi1> to vector<24x32xi1>
    %237 = arith.select %236, %225, %202 : vector<24x32xi1>, vector<24x32xf32>
    %c6 = arith.constant 6 : index
    %c0_73 = arith.constant 0 : index
    %c0_74 = arith.constant 0 : index
    %238 = vector.load %arg15[%c6, %c0_73, %c0_74] : memref<8x24x128xf32, #tpu.memory_space<vmem>>, vector<1x24x128xf32>
    %239 = vector.shape_cast %238 : vector<1x24x128xf32> to vector<24x128xf32>
    %240 = vector.broadcast %23 : vector<24x1xf32> to vector<24x32xf32>
    %241 = arith.mulf %234, %240 : vector<24x32xf32>
    %242 = vector.broadcast %25 : vector<24x1xf32> to vector<24x32xf32>
    %243 = arith.mulf %234, %242 : vector<24x32xf32>
    %244 = tpu.concatenate %241, %243 in 1 : vector<24x32xf32>, vector<24x32xf32> -> vector<24x64xf32>
    %cst_75 = arith.constant dense<0.000000e+00> : vector<24x128xf32>
    %245 = tpu.matmul %244, %18, %cst_75 {dimension_numbers = #tpu.dot_dimension_numbers<[1], [0], [0], [1], [0, 0, 1, 1], [], []>} : vector<24x64xf32>, vector<64x128xf32>, vector<24x128xf32> -> vector<24x128xf32>
    %246 = arith.addf %239, %245 : vector<24x128xf32>
    %247 = vector.extract_strided_slice %246 {offsets = [0, 0], sizes = [24, 96], strides = [1, 1]} : vector<24x128xf32> to vector<24x96xf32>
    %248 = arith.negf %247 : vector<24x96xf32>
    %249 = math.exp %248 : vector<24x96xf32>
    %cst_76 = arith.constant 1.000000e+00 : f32
    %250 = vector.broadcast %cst_76 : f32 to vector<24x96xf32>
    %251 = arith.addf %250, %249 : vector<24x96xf32>
    %252 = arith.divf %250, %251 : vector<24x96xf32>
    %253 = vector.extract_strided_slice %246 {offsets = [0, 96], sizes = [24, 32], strides = [1, 1]} : vector<24x128xf32> to vector<24x32xf32>
    %254 = math.tanh %253 : vector<24x32xf32>
    %255 = vector.extract_strided_slice %252 {offsets = [0, 0], sizes = [24, 32], strides = [1, 1]} : vector<24x96xf32> to vector<24x32xf32>
    %256 = vector.extract_strided_slice %252 {offsets = [0, 32], sizes = [24, 32], strides = [1, 1]} : vector<24x96xf32> to vector<24x32xf32>
    %257 = vector.extract_strided_slice %252 {offsets = [0, 64], sizes = [24, 32], strides = [1, 1]} : vector<24x96xf32> to vector<24x32xf32>
    %258 = arith.mulf %256, %237 : vector<24x32xf32>
    %259 = arith.mulf %255, %254 : vector<24x32xf32>
    %260 = arith.addf %258, %259 : vector<24x32xf32>
    %261 = math.tanh %260 : vector<24x32xf32>
    %262 = arith.mulf %257, %261 : vector<24x32xf32>
    %c6_77 = arith.constant 6 : index
    %c0_78 = arith.constant 0 : index
    %c0_79 = arith.constant 0 : index
    %263 = vector.load %arg2[%c6_77, %c0_78, %c0_79] : memref<8x24x1xf32, #tpu.memory_space<vmem>>, vector<1x24x1xf32>
    %264 = vector.shape_cast %263 : vector<1x24x1xf32> to vector<24x1xf32>
    %cst_80 = arith.constant 0.000000e+00 : f32
    %265 = vector.broadcast %cst_80 : f32 to vector<24x1xf32>
    %266 = arith.cmpf one, %264, %265 : vector<24x1xf32>
    %267 = vector.shape_cast %266 : vector<24x1xi1> to vector<24x1xi1>
    %268 = vector.broadcast %267 : vector<24x1xi1> to vector<24x32xi1>
    %269 = arith.select %268, %262, %234 : vector<24x32xi1>, vector<24x32xf32>
    %270 = vector.shape_cast %266 : vector<24x1xi1> to vector<24x1xi1>
    %271 = vector.broadcast %270 : vector<24x1xi1> to vector<24x32xi1>
    %272 = arith.select %271, %260, %237 : vector<24x32xi1>, vector<24x32xf32>
    %c7 = arith.constant 7 : index
    %c0_81 = arith.constant 0 : index
    %c0_82 = arith.constant 0 : index
    %273 = vector.load %arg15[%c7, %c0_81, %c0_82] : memref<8x24x128xf32, #tpu.memory_space<vmem>>, vector<1x24x128xf32>
    %274 = vector.shape_cast %273 : vector<1x24x128xf32> to vector<24x128xf32>
    %275 = vector.broadcast %23 : vector<24x1xf32> to vector<24x32xf32>
    %276 = arith.mulf %269, %275 : vector<24x32xf32>
    %277 = vector.broadcast %25 : vector<24x1xf32> to vector<24x32xf32>
    %278 = arith.mulf %269, %277 : vector<24x32xf32>
    %279 = tpu.concatenate %276, %278 in 1 : vector<24x32xf32>, vector<24x32xf32> -> vector<24x64xf32>
    %cst_83 = arith.constant dense<0.000000e+00> : vector<24x128xf32>
    %280 = tpu.matmul %279, %18, %cst_83 {dimension_numbers = #tpu.dot_dimension_numbers<[1], [0], [0], [1], [0, 0, 1, 1], [], []>} : vector<24x64xf32>, vector<64x128xf32>, vector<24x128xf32> -> vector<24x128xf32>
    %281 = arith.addf %274, %280 : vector<24x128xf32>
    %282 = vector.extract_strided_slice %281 {offsets = [0, 0], sizes = [24, 96], strides = [1, 1]} : vector<24x128xf32> to vector<24x96xf32>
    %283 = arith.negf %282 : vector<24x96xf32>
    %284 = math.exp %283 : vector<24x96xf32>
    %cst_84 = arith.constant 1.000000e+00 : f32
    %285 = vector.broadcast %cst_84 : f32 to vector<24x96xf32>
    %286 = arith.addf %285, %284 : vector<24x96xf32>
    %287 = arith.divf %285, %286 : vector<24x96xf32>
    %288 = vector.extract_strided_slice %281 {offsets = [0, 96], sizes = [24, 32], strides = [1, 1]} : vector<24x128xf32> to vector<24x32xf32>
    %289 = math.tanh %288 : vector<24x32xf32>
    %290 = vector.extract_strided_slice %287 {offsets = [0, 0], sizes = [24, 32], strides = [1, 1]} : vector<24x96xf32> to vector<24x32xf32>
    %291 = vector.extract_strided_slice %287 {offsets = [0, 32], sizes = [24, 32], strides = [1, 1]} : vector<24x96xf32> to vector<24x32xf32>
    %292 = vector.extract_strided_slice %287 {offsets = [0, 64], sizes = [24, 32], strides = [1, 1]} : vector<24x96xf32> to vector<24x32xf32>
    %293 = arith.mulf %291, %272 : vector<24x32xf32>
    %294 = arith.mulf %290, %289 : vector<24x32xf32>
    %295 = arith.addf %293, %294 : vector<24x32xf32>
    %296 = math.tanh %295 : vector<24x32xf32>
    %297 = arith.mulf %292, %296 : vector<24x32xf32>
    %c7_85 = arith.constant 7 : index
    %c0_86 = arith.constant 0 : index
    %c0_87 = arith.constant 0 : index
    %298 = vector.load %arg2[%c7_85, %c0_86, %c0_87] : memref<8x24x1xf32, #tpu.memory_space<vmem>>, vector<1x24x1xf32>
    %299 = vector.shape_cast %298 : vector<1x24x1xf32> to vector<24x1xf32>
    %cst_88 = arith.constant 0.000000e+00 : f32
    %300 = vector.broadcast %cst_88 : f32 to vector<24x1xf32>
    %301 = arith.cmpf one, %299, %300 : vector<24x1xf32>
    %302 = vector.shape_cast %301 : vector<24x1xi1> to vector<24x1xi1>
    %303 = vector.broadcast %302 : vector<24x1xi1> to vector<24x32xi1>
    %304 = arith.select %303, %297, %269 : vector<24x32xi1>, vector<24x32xf32>
    %305 = vector.extract_strided_slice %304 {offsets = [0, 0], sizes = [8, 32], strides = [1, 1]} : vector<24x32xf32> to vector<8x32xf32>
    %306 = vector.extract_strided_slice %304 {offsets = [8, 0], sizes = [8, 32], strides = [1, 1]} : vector<24x32xf32> to vector<8x32xf32>
    %307 = vector.extract_strided_slice %304 {offsets = [16, 0], sizes = [8, 32], strides = [1, 1]} : vector<24x32xf32> to vector<8x32xf32>
    %c0_89 = arith.constant 0 : index
    %c0_90 = arith.constant 0 : index
    %308 = vector.load %arg8[%c0_89, %c0_90] : memref<32x32xf32, #tpu.memory_space<vmem>>, vector<32x32xf32>
    %cst_91 = arith.constant dense<0.000000e+00> : vector<8x32xf32>
    %309 = tpu.matmul %305, %308, %cst_91 {dimension_numbers = #tpu.dot_dimension_numbers<[1], [0], [0], [1], [0, 0, 1, 1], [], []>} : vector<8x32xf32>, vector<32x32xf32>, vector<8x32xf32> -> vector<8x32xf32>
    %c0_92 = arith.constant 0 : index
    %c0_93 = arith.constant 0 : index
    %310 = vector.load %arg9[%c0_92, %c0_93] : memref<32x32xf32, #tpu.memory_space<vmem>>, vector<32x32xf32>
    %cst_94 = arith.constant dense<0.000000e+00> : vector<8x32xf32>
    %311 = tpu.matmul %306, %310, %cst_94 {dimension_numbers = #tpu.dot_dimension_numbers<[1], [0], [0], [1], [0, 0, 1, 1], [], []>} : vector<8x32xf32>, vector<32x32xf32>, vector<8x32xf32> -> vector<8x32xf32>
    %312 = arith.addf %309, %311 : vector<8x32xf32>
    %c0_95 = arith.constant 0 : index
    %c0_96 = arith.constant 0 : index
    %313 = vector.load %arg10[%c0_95, %c0_96] : memref<32x32xf32, #tpu.memory_space<vmem>>, vector<32x32xf32>
    %cst_97 = arith.constant dense<0.000000e+00> : vector<8x32xf32>
    %314 = tpu.matmul %307, %313, %cst_97 {dimension_numbers = #tpu.dot_dimension_numbers<[1], [0], [0], [1], [0, 0, 1, 1], [], []>} : vector<8x32xf32>, vector<32x32xf32>, vector<8x32xf32> -> vector<8x32xf32>
    %315 = arith.addf %312, %314 : vector<8x32xf32>
    %c0_98 = arith.constant 0 : index
    %c0_99 = arith.constant 0 : index
    %316 = vector.load %arg11[%c0_98, %c0_99] : memref<1x32xf32, #tpu.memory_space<vmem>>, vector<1x32xf32>
    %317 = vector.broadcast %316 : vector<1x32xf32> to vector<8x32xf32>
    %318 = arith.addf %315, %317 : vector<8x32xf32>
    %cst_100 = arith.constant 0.000000e+00 : f32
    %319 = vector.broadcast %cst_100 : f32 to vector<8x32xf32>
    %320 = arith.maximumf %318, %319 : vector<8x32xf32>
    %c0_101 = arith.constant 0 : index
    %c0_102 = arith.constant 0 : index
    %321 = vector.load %arg12[%c0_101, %c0_102] : memref<32x1xf32, #tpu.memory_space<vmem>>, vector<32x1xf32>
    %cst_103 = arith.constant dense<0.000000e+00> : vector<8x1xf32>
    %322 = tpu.matmul %320, %321, %cst_103 {dimension_numbers = #tpu.dot_dimension_numbers<[1], [0], [0], [1], [0, 0, 1, 1], [], []>} : vector<8x32xf32>, vector<32x1xf32>, vector<8x1xf32> -> vector<8x1xf32>
    %c0_104 = arith.constant 0 : index
    %c0_105 = arith.constant 0 : index
    %323 = vector.load %arg13[%c0_104, %c0_105] : memref<1x1xf32, #tpu.memory_space<vmem>>, vector<1x1xf32>
    %324 = vector.broadcast %323 : vector<1x1xf32> to vector<8x1xf32>
    %325 = arith.addf %322, %324 : vector<8x1xf32>
    %326 = arith.negf %325 : vector<8x1xf32>
    %327 = math.exp %326 : vector<8x1xf32>
    %cst_106 = arith.constant 1.000000e+00 : f32
    %328 = vector.broadcast %cst_106 : f32 to vector<8x1xf32>
    %329 = arith.addf %328, %327 : vector<8x1xf32>
    %330 = arith.divf %328, %329 : vector<8x1xf32>
    %331 = tpu.concatenate %325, %330 in 1 : vector<8x1xf32>, vector<8x1xf32> -> vector<8x2xf32>
    %c0_107 = arith.constant 0 : index
    %c0_108 = arith.constant 0 : index
    %332 = vector.load %arg14[%c0_107, %c0_108] : memref<8x2xf32, #tpu.memory_space<vmem>>, vector<8x2xf32>
    tpu.vector_store %arg14[%c0_107, %c0_108], %331 {strides = array<i32>} : memref<8x2xf32, #tpu.memory_space<vmem>>, vector<8x2xf32>,
    return
  }
}

</mosaic_0001>

<bundles_post_ra>
// kernel: resnet_lstm_forward.1
= control target key start
LH: loop header
LB: loop body
LE: loop exit
PB: predicated region body
PF: predicated region fallthrough
CT: control target
= control target key end

     0   :  { %vm232_vm0 = vcmask 261120   ;;  %vm114_vm1 = vcmask 523264   ;;  %v2579_v17 = vmov 0.0   ;;  %s2580_s15 = smov 32   ;;  %v2581_v45 = vmov 0   ;;  %s2582_s22 = smov 64   ;;  %s3650_s5 = inlined_call_operand.vmem [shape: bf16[32,128], index: 5, kind: input, shape index: {}]   ;;  %s3651_s3 = inlined_call_operand.vmem [shape: bf16[64,128], index: 3, kind: input, shape index: {}]   ;;  %s3652_s7 = inlined_call_operand.vmem [shape: f32[64,128], index: 7, kind: input, shape index: {}]   ;;  %s3653_s1 = inlined_call_operand.vmem [shape: bf16[8,16,32], index: 1, kind: input, shape index: {}]   ;;  %s3654_s6 = inlined_call_operand.vmem [shape: f32[1,128], index: 6, kind: input, shape index: {}]   ;;  %s3655_s0 = inlined_call_operand.vmem [shape: bf16[8,8,64], index: 0, kind: input, shape index: {}]   ;;  %s3656_s4 = inlined_call_operand.vmem [shape: f32[1,128], index: 4, kind: input, shape index: {}]   ;;  %s3657_s2 = inlined_call_operand.vmem [shape: f32[8,24,1], index: 2, kind: input, shape index: {}]   ;;  %s3658_s9 = inlined_call_operand.vmem [shape: f32[32,32], index: 9, kind: input, shape index: {}]   ;;  %s3659_s10 = inlined_call_operand.vmem [shape: f32[32,32], index: 10, kind: input, shape index: {}]   ;;  %s3660_s8 = inlined_call_operand.vmem [shape: f32[32,32], index: 8, kind: input, shape index: {}]   ;;  %s3661_s11 = inlined_call_operand.vmem [shape: f32[1,32], index: 11, kind: input, shape index: {}]   ;;  %s3662_s12 = inlined_call_operand.vmem [shape: f32[32,1], index: 12, kind: input, shape index: {}]   ;;  %s3663_s13 = inlined_call_operand.<no memory space> [shape: f32[1,1], index: 13, kind: input, shape index: {}]   ;;  %s3664_s14 = inlined_call_operand.vmem [shape: f32[8,2], index: 14, kind: output, shape index: {}]  }
   0x1   :  { %v2365_v0 = vld [vmem:[%s3650_s5 + $0x8] sm:$0xff]  ;;  %v2355_v1 = vld [vmem:[%s3651_s3 + $0x18] sm:$0xff]  ;;  %v2364_v2 = vld [vmem:[%s3650_s5] sm:$0xff]  ;;  %2374 = vset.pattern.permute.xlu1 %v2581_v45  ;;  %2376 = vset.pattern.permute.xlu2 %v2581_v45  ;;  %s2583_s23 = smov 96  }
   0x2   :  { %2366 = vmatpush.bf16.msra.mxu2 %v2365_v0  ;;  %131 = vmatpush.bf16.msra.mxu0 %v2355_v1  ;;  %v2672_v3 = vld [vmem:[%s3652_s7 + $0x38] sm:$0xff]  ;;  %v2354_v4 = vld [vmem:[%s3651_s3 + $0x10] sm:$0xff]  ;;  %v2353_v7 = vld [vmem:[%s3651_s3 + $0x8] sm:$0xff] }
   0x3   :  { %263 = vmatpush.bf16.msra.mxu1 %v2365_v0  ;;  %596 = vmatpush.msra.mxu3 %v2672_v3  ;;  %v2681_v5 = vld [vmem:[%s3652_s7 + $0x30] sm:$0xff]  ;;  %v2363_v6 = vld [vmem:[%s3653_s1 + $0x38] sm:$0xff]  ;;  %v2694_v8 = vld [vmem:[%s3652_s7 + $0x28] sm:$0xff] }
   0x4   :  { %v2356_v9 = vld [vmem:[%s3653_s1] sm:$0xff]  ;;  %v2716_v12 = vld [vmem:[%s3652_s7 + $0x18] sm:$0xff]  ;;  %v2726_v14 = vld [vmem:[%s3652_s7 + $0x10] sm:$0xff]  ;;  %2375 = vset.pattern.permute.xlu0 %v2581_v45 }
   0x5   :  { %597 = vmatpush.msra.mxu3 %v2681_v5  ;;  %v2705_v10 = vld [vmem:[%s3652_s7 + $0x20] sm:$0xff]  ;;  %v2734_v15 = vld [vmem:[%s3652_s7 + $0x8] sm:$0xff] }
   0x6   :  { %2367 = vmatpush.bf16.msra.mxu2 %v2364_v2  ;;  %132 = vmatpush.bf16.msra.mxu0 %v2354_v4  ;;  %v2352_v11 = vld [vmem:[%s3651_s3] sm:$0xff] }
   0x7   :  { %264 = vmatpush.bf16.msra.mxu1 %v2364_v2  ;;  %598 = vmatpush.msra.mxu3 %v2694_v8  ;;  %v2348_v13 = vld [vmem:[%s3655_s0] sm:$0xff] }
   0x8   :  { %v2742_v16 = vld [vmem:[%s3652_s7] sm:$0xff] }
   0x9   :  { %2276 = vmatmul.msk.bf16.vlgmr.msra.gmra.mxu2 %vm232_vm0, %v2363_v6  ;;  %599 = vmatpush.msra.mxu3 %v2705_v10  ;;  %v2785_v20 = vld [vmem:[%s3656_s4] ss:$0 sm:$0xff] }
   0xa   :  { %383 = vmatpush.msrb.mxu2 %v2672_v3  ;;  %133 = vmatpush.bf16.msra.mxu0 %v2353_v7  ;;  %v2791_v26 = vld [vmem:[%s3654_s6] ss:$0 sm:$0xff] }
   0xb   :  { %2269 = vmatmul.msk.bf16.vlgmr.msra.gmra.mxu1 %vm232_vm0, %v2356_v9  ;;  %600 = vmatpush.msra.mxu3 %v2716_v12  ;;  %v515_v7 = vld [vmem:[%s3657_s2] sm:$0xff] }
   0xc   :  { %384 = vmatpush.msrb.mxu2 %v2681_v5  ;;  %vm518_vm10 = vcmp.ne.f32.partialorder %v515_v7, 0.0 }
   0xd   :  { %601 = vmatpush.msra.mxu3 %v2726_v14 }
   0xe   :  { %385 = vmatpush.msrb.mxu2 %v2694_v8  ;;  %134 = vmatpush.bf16.msra.mxu0 %v2352_v11 }
   0xf   :  { %602 = vmatpush.msra.mxu3 %v2734_v15 }
  0x10   :  { %386 = vmatpush.msrb.mxu2 %v2705_v10 }
  0x11   :  { %2225 = vmatmul.msk.bf16.vlgmr.msra.gmra.mxu0 %vm114_vm1, %v2348_v13  ;;  %603 = vmatpush.msra.mxu3 %v2742_v16 }
  0x12   :  { %1666 = vmatpush.msrb.mxu0 %v2672_v3  ;;  %387 = vmatpush.msrb.mxu2 %v2716_v12 }
  0x13   :  { %1024 = vmatpush.msrb.mxu3 %v2672_v3 }
  0x14   :  { %388 = vmatpush.msrb.mxu2 %v2726_v14  ;;  %1667 = vmatpush.msrb.mxu0 %v2681_v5 }
  0x15   :  { %1025 = vmatpush.msrb.mxu3 %v2681_v5 }
  0x16   :  { %389 = vmatpush.msrb.mxu2 %v2734_v15  ;;  %1668 = vmatpush.msrb.mxu0 %v2694_v8 }
  0x17   :  { %1026 = vmatpush.msrb.mxu3 %v2694_v8 }
  0x18   :  { %390 = vmatpush.msrb.mxu2 %v2742_v16  ;;  %1669 = vmatpush.msrb.mxu0 %v2705_v10 }
  0x19   :  { %391 = vmatmul.f32.vlgmr.msrb.gmra.mxu2 %v2579_v17  ;;  %1027 = vmatpush.msrb.mxu3 %v2705_v10 }
  0x1a   :  { %810 = vmatpush.msra.mxu2 %v2672_v3  ;;  %1670 = vmatpush.msrb.mxu0 %v2716_v12 }
  0x1b   :  { %1028 = vmatpush.msrb.mxu3 %v2716_v12 }
  0x1c   :  { %811 = vmatpush.msra.mxu2 %v2681_v5  ;;  %1671 = vmatpush.msrb.mxu0 %v2726_v14 }
  0x1d   :  { %1029 = vmatpush.msrb.mxu3 %v2726_v14 }
  0x1e   :  { %812 = vmatpush.msra.mxu2 %v2694_v8  ;;  %1672 = vmatpush.msrb.mxu0 %v2734_v15 }
  0x1f   :  { %1030 = vmatpush.msrb.mxu3 %v2734_v15 }
  0x20   :  { %813 = vmatpush.msra.mxu2 %v2705_v10  ;;  %1673 = vmatpush.msrb.mxu0 %v2742_v16 }
  0x21   :  { %394 = vmatmul.f32.gmra.mxu2 %v2579_v17  ;;  %1031 = vmatpush.msrb.mxu3 %v2742_v16 }
  0x22   :  { %814 = vmatpush.msra.mxu2 %v2716_v12 }
  0x24   :  { %815 = vmatpush.msra.mxu2 %v2726_v14 }
  0x26   :  { %816 = vmatpush.msra.mxu2 %v2734_v15 }
  0x28   :  { %817 = vmatpush.msra.mxu2 %v2742_v16 }
  0x29   :  { %397 = vmatmul.f32.gmra.mxu2 %v2579_v17 }
  0x2a   :  { %1238 = vmatpush.msrb.mxu2 %v2672_v3 }
  0x2c   :  { %1239 = vmatpush.msrb.mxu2 %v2681_v5 }
  0x2e   :  { %1240 = vmatpush.msrb.mxu2 %v2694_v8 }
  0x30   :  { %1241 = vmatpush.msrb.mxu2 %v2705_v10 }
  0x32   :  { %1242 = vmatpush.msrb.mxu2 %v2716_v12 }
  0x34   :  { %1243 = vmatpush.msrb.mxu2 %v2726_v14 }
  0x36   :  { %1244 = vmatpush.msrb.mxu2 %v2734_v15 }
  0x38   :  { %1245 = vmatpush.msrb.mxu2 %v2742_v16 }
  0x88   :  { %v266_v24 = vpop.f32.mrf.mxu1 }
  0x89   :  { %v267_v27 = vadd.f32 %v2791_v26, %v266_v24 }
  0x8c   :  { %v2778_v18 = vpop.f32.mrf.mxu2 }
  0x8e   :  { %v136_v21 = vpop.f32.mrf.mxu0 }
  0x8f   :  { %v137_v22 = vadd.f32 %v2785_v20, %v136_v21 }
  0x90   :  { %v268_v31 = vpop.f32.mrf.mxu1 }
  0x91   :  { %v269_v32 = vadd.f32 %v2791_v26, %v268_v31 }
  0x94   :  { %v2780_v19 = vpop.f32.mrf.mxu2 }
  0x9c   :  { %v392_v23 = vpop.f32.mrf.mxu2 }
  0x9d   :  { %v401_v25 = vadd.f32 %v392_v23, %v137_v22  ;;  %v521_v22 = vsel %vm518_vm10, 1, %v2581_v45 }
  0x9f   :  { %2381 = vtanh.f32 %v401_v25  ;;  %v2277_v37 = vmul.f32 -1.442695, %v401_v25 }
  0xa4   :  { %v395_v28 = vpop.f32.mrf.mxu2 }
  0xa5   :  { %v2382_v29 = vpop.eup %2381  ;;  %v402_v30 = vadd.f32 %v395_v28, %v267_v27 }
  0xa6   :  { %470 = vrot.lane.b32.xlu0 %v2382_v29, %s2580_s15 }
  0xa7   :  { %2383 = vtanh.f32 %v402_v30  ;;  %v2278_v38 = vmul.f32 -1.442695, %v402_v30 }
  0xac   :  { %v398_v33 = vpop.f32.mrf.mxu2 }
  0xad   :  { %v2384_v34 = vpop.eup %2383  ;;  %v403_v35 = vadd.f32 %v398_v33, %v269_v32 }
  0xae   :  { %472 = vrot.lane.b32.xlu0 %v2384_v34, %s2580_s15 }
  0xaf   :  { %2385 = vtanh.f32 %v403_v35  ;;  %v2279_v41 = vmul.f32 -1.442695, %v403_v35 }
  0xb0   :  { %2387 = vpow2.f32 %v2277_v37 }
  0xb1   :  { %2389 = vpow2.f32 %v2278_v38 }
  0xb5   :  { %v2386_v36 = vpop.eup %2385 }
  0xb6   :  { %474 = vrot.lane.b32.xlu1 %v2386_v36, %s2580_s15  ;;  %v2388_v39 = vpop.eup %2387 }
  0xb7   :  { %v413_v40 = vadd.f32 1.0, %v2388_v39  ;;  %v2390_v42 = vpop.eup %2389 }
  0xb8   :  { %v414_v43 = vadd.f32 1.0, %v2390_v42 }
  0xb9   :  { %2391 = vrcp.f32 %v413_v40  ;;  %v427_v56 = vand.u32 2147483648, %v413_v40  ;;  %vm421_vm3 = vweird.f32 %v413_v40  ;;  %v425_v57 = vand.u32 2147483647, %v413_v40 }
  0xba   :  { %2393 = vpow2.f32 %v2279_v41  ;;  %vm436_vm6 = vweird.f32 %v414_v43  ;;  %v442_v0 = vand.u32 2147483648, %v414_v43  ;;  %v440_v4 = vand.u32 2147483647, %v414_v43 }
  0xbb   :  { %2395 = vrcp.f32 %v414_v43  ;;  %v428_v61 = vor.u32 1.1754944e-38, %v427_v56  ;;  %vm426_vm5 = vcmp.eq.f32.partialorder %v425_v57, 8.507059e+37 }
  0xbc   :  { %v443_v9 = vor.u32 1.1754944e-38, %v442_v0  ;;  %vm441_vm9 = vcmp.eq.f32.partialorder %v440_v4, 8.507059e+37 }
  0xbf   :  { %v2392_v44 = vpop.eup %2391 }
  0xc0   :  { %v2394_v46 = vpop.eup %2393  ;;  %v417_v47 = vmul.f32 %v2392_v44, %v413_v40  ;;  %vm422_vm2 = vweird.f32 %v2392_v44  ;;  %v517_v40 = vld [vmem:[%s3657_s2 + $0x10] sm:$0xff] }
  0xc1   :  { %v415_v48 = vadd.f32 1.0, %v2394_v46  ;;  %v2396_v50 = vpop.eup %2395  ;;  %vm423_vm4 = vmor %vm421_vm3, %vm422_vm2  ;;  %vm520_vm15 = vcmp.ne.f32.partialorder %v517_v40, 0.0 }
  0xc2   :  { %v418_v49 = vsub.f32 1.0, %v417_v47  ;;  %v432_v52 = vmul.f32 %v2396_v50, %v414_v43  ;;  %vm437_vm7 = vweird.f32 %v2396_v50  ;;  %v523_v42 = vsel %vm520_vm15, 1, %v2581_v45 }
  0xc3   :  { %2397 = vrcp.f32 %v415_v48  ;;  %vm438_vm8 = vmor %vm436_vm6, %vm437_vm7  ;;  %vm451_vm11 = vweird.f32 %v415_v48  ;;  %v457_v23 = vand.u32 2147483648, %v415_v48  ;;  %v455_v27 = vand.u32 2147483647, %v415_v48 }
  0xc4   :  { %v419_v51 = vmul.f32 %v2392_v44, %v418_v49  ;;  %v433_v54 = vsub.f32 1.0, %v432_v52 }
  0xc5   :  { %v458_v28 = vor.u32 1.1754944e-38, %v457_v23  ;;  %vm456_vm14 = vcmp.eq.f32.partialorder %v455_v27, 8.507059e+37 }
  0xc6   :  { %v420_v53 = vadd.f32 %v2392_v44, %v419_v51  ;;  %v434_v59 = vmul.f32 %v2396_v50, %v433_v54 }
  0xc8   :  { %v424_v58 = vsel %vm423_vm4, %v2392_v44, %v420_v53  ;;  %v435_v2 = vadd.f32 %v2396_v50, %v434_v59 }
  0xc9   :  { %v2398_v55 = vpop.eup %2397  ;;  %v429_v63 = vsel %vm426_vm5, %v428_v61, %v424_v58 }
  0xca   :  { %v447_v60 = vmul.f32 %v2398_v55, %v415_v48  ;;  %v439_v11 = vsel %vm438_vm8, %v2396_v50, %v435_v2  ;;  %vm452_vm12 = vweird.f32 %v2398_v55  ;;  %v464_v41 = vmul.f32 0.0, %v429_v63  ;;  %v516_v48 = vld [vmem:[%s3657_s2 + $0x8] sm:$0xff] }
  0xcb   :  { %v444_v17 = vsel %vm441_vm9, %v443_v9, %v439_v11  ;;  %vm453_vm13 = vmor %vm451_vm11, %vm452_vm12  ;;  %vm519_vm2 = vcmp.ne.f32.partialorder %v516_v48, 0.0 }
  0xcc   :  { %v448_v6 = vsub.f32 1.0, %v447_v60  ;;  %v465_v33 = vmul.f32 0.0, %v444_v17  ;;  %v522_v49 = vsel %vm519_vm2, 1, %v2581_v45 }
  0xce   :  { %v449_v13 = vmul.f32 %v2398_v55, %v448_v6 }
  0xd0   :  { %v450_v25 = vadd.f32 %v2398_v55, %v449_v13 }
  0xd2   :  { %v454_v29 = vsel %vm453_vm13, %v2398_v55, %v450_v25 }
  0xd3   :  { %v459_v31 = vsel %vm456_vm14, %v458_v28, %v454_v29 }
  0xd4   :  { %v466_v36 = vmul.f32 0.0, %v459_v31 }
 0x118   :  { %v471_v62 = vpop.permute.xlu0 %470 }
 0x119   :  { %v479_v1 = vmul.f32 %v471_v62, %v429_v63 }
 0x11b   :  { %485 = vrot.lane.b32.xlu1 %v479_v1, %s2580_s15  ;;  %v2357_v1 = vld [vmem:[%s3653_s1 + $0x8] sm:$0xff] }
 0x11c   :  { %2270 = vmatmul.msk.bf16.gmra.mxu1 %vm232_vm0, %v2357_v1 }
 0x120   :  { %v473_v21 = vpop.permute.xlu0 %472 }
 0x121   :  { %v480_v24 = vmul.f32 %v473_v21, %v444_v17 }
 0x123   :  { %487 = vrot.lane.b32.xlu2 %v480_v24, %s2580_s15  ;;  %525 = vperm.xlu1 %2374, %v521_v22   ;;  %v138_v22 = vpop.f32.mrf.mxu0 }
 0x124   :  { %v139_v23 = vadd.f32 %v2785_v20, %v138_v22 }
 0x128   :  { %v475_v30 = vpop.permute.xlu1 %474 }
 0x129   :  { %v481_v32 = vmul.f32 %v475_v30, %v459_v31 }
 0x12b   :  { %489 = vrot.lane.b32.xlu2 %v481_v32, %s2580_s15 }
 0x17d   :  { %v488_v34 = vpop.permute.xlu2 %487 }
 0x17e   :  { %v2808_v35 = vadd.f32 %v488_v34, %v465_v33 }
 0x180   :  { %2399 = vtanh.f32 %v2808_v35 }
 0x185   :  { %v490_v37 = vpop.permute.xlu2 %489 }
 0x186   :  { %v2400_v38 = vpop.eup %2399  ;;  %v2811_v39 = vadd.f32 %v490_v37, %v466_v36 }
 0x187   :  { %505 = vrot.lane.b32.xlu2 %v2400_v38, %s2580_s15 }
 0x188   :  { %2401 = vtanh.f32 %v2811_v39 }
 0x18d   :  { %v486_v43 = vpop.permute.xlu1 %485 }
 0x18e   :  { %v2402_v44 = vpop.eup %2401  ;;  %v2819_v46 = vadd.f32 %v486_v43, %v464_v41 }
 0x18f   :  { %531 = vperm.xlu2 %2376, %v523_v42   ;;  %507 = vrot.lane.b32.xlu1 %v2402_v44, %s2580_s15 }
 0x190   :  { %2403 = vtanh.f32 %v2819_v46 }
 0x195   :  { %v2828_v50 = vpop.permute.xlu1 %525 }
 0x196   :  { %v2404_v47 = vpop.eup %2403  ;;  %vm533_vm3 = vcmp.eq.s32.totalorder %v2828_v50, 1 }
 0x197   :  { %503 = vrot.lane.b32.xlu0 %v2404_v47, %s2580_s15 }
 0x199   :  { %v271_v27 = vpop.f32.mrf.mxu1 }
 0x19a   :  { %v272_v28 = vadd.f32 %v2791_v26, %v271_v27 }
 0x19f   :  { %528 = vperm.xlu0 %2375, %v522_v49  }
 0x1a1   :  { %v273_v32 = vpop.f32.mrf.mxu1 }
 0x1a2   :  { %v274_v33 = vadd.f32 %v2791_v26, %v273_v32 }
 0x1e1   :  { %v506_v51 = vpop.permute.xlu2 %505 }
 0x1e2   :  { %v513_v59 = vmul.f32 %v506_v51, %v444_v17 }
 0x1e9   :  { %v2838_v57 = vpop.permute.xlu2 %531 }
 0x1ea   :  { %vm535_vm4 = vcmp.eq.s32.totalorder %v2838_v57, 1 }
 0x201   :  { %v508_v54 = vpop.permute.xlu1 %507 }
 0x202   :  { %v514_v58 = vmul.f32 %v508_v54, %v459_v31 }
 0x204   :  { %v2846_v61 = vsel %vm535_vm4, %v514_v58, 0.0 }
 0x205   :  { %v548_v0 = vmul.f32 0.0, %v2846_v61 }
 0x209   :  { %v504_v52 = vpop.permute.xlu0 %503 }
 0x20a   :  { %v512_v53 = vmul.f32 %v504_v52, %v429_v63 }
 0x20c   :  { %v2833_v55 = vsel %vm533_vm3, %v512_v53, 0.0 }
 0x20d   :  { %555 = vrot.lane.b32.xlu1 %v2833_v55, %s2582_s22  ;;  %v549_v56 = vmul.f32 0.0, %v2833_v55 }
 0x20f   :  { %567 = vrot.lane.b32.xlu2 %v549_v56, %s2583_s23 }
 0x211   :  { %v2842_v60 = vpop.permute.xlu0 %528 }
 0x212   :  { %vm534_vm5 = vcmp.eq.s32.totalorder %v2842_v60, 1 }
 0x213   :  { %v2851_v62 = vsel %vm534_vm5, %v513_v59, 0.0 }
 0x214   :  { %v547_v63 = vmul.f32 0.0, %v2851_v62 }
 0x215   :  { %569 = vrot.lane.b32.xlu1 %v2851_v62, %s2583_s23 }
 0x216   :  { %557 = vrot.lane.b32.xlu0 %v547_v63, %s2582_s22 }
 0x217   :  { %559 = vrot.lane.b32.xlu2 %v548_v0, %s2582_s22 }
 0x21e   :  { %571 = vrot.lane.b32.xlu0 %v2846_v61, %s2583_s23 }
 0x269   :  { %v568_v2 = vpop.permute.xlu2 %567 }
 0x271   :  { %v560_v13 = vpop.permute.xlu2 %559 }
 0x27f   :  { %v556_v4 = vpop.permute.xlu1 %555 }
 0x280   :  { %v576_v6 = vsel %vm232_vm0, %v556_v4, %v568_v2 }
 0x281   :  { %2280 = vmatmul.msk.f32.vlgmr.msra.gmra.mxu3 %vm114_vm1, %v576_v6 }
 0x282   :  { %1452 = vmatpush.msra.mxu3 %v2672_v3 }
 0x284   :  { %1453 = vmatpush.msra.mxu3 %v2681_v5 }
 0x286   :  { %1454 = vmatpush.msra.mxu3 %v2694_v8 }
 0x287   :  { %v570_v7 = vpop.permute.xlu1 %569 }
 0x288   :  { %v558_v9 = vpop.permute.xlu0 %557  ;;  %1455 = vmatpush.msra.mxu3 %v2705_v10 }
 0x289   :  { %v577_v11 = vsel %vm232_vm0, %v558_v9, %v570_v7 }
 0x28a   :  { %2281 = vmatmul.msk.f32.gmra.mxu3 %vm114_vm1, %v577_v11 }
 0x28b   :  { %1456 = vmatpush.msra.mxu3 %v2716_v12 }
 0x28d   :  { %1457 = vmatpush.msra.mxu3 %v2726_v14 }
 0x28f   :  { %1458 = vmatpush.msra.mxu3 %v2734_v15 }
 0x290   :  { %v572_v17 = vpop.permute.xlu0 %571 }
 0x291   :  { %v578_v21 = vsel %vm232_vm0, %v560_v13, %v572_v17  ;;  %1459 = vmatpush.msra.mxu3 %v2742_v16  ;;  %v2286_v13 = vld [vmem:[%s3657_s2 + $0x18] sm:$0xff] }
 0x292   :  { %2282 = vmatmul.msk.f32.gmra.mxu3 %vm114_vm1, %v578_v21  ;;  %vm732_vm10 = vcmp.ne.f32.partialorder %v2286_v13, 0.0 }
 0x293   :  { %v735_v21 = vsel %vm732_vm10, 1, %v2581_v45 }
 0x304   :  { %v605_v24 = vpop.f32.mrf.mxu3 }
 0x305   :  { %v614_v25 = vadd.f32 %v605_v24, %v139_v23 }
 0x307   :  { %2405 = vtanh.f32 %v614_v25  ;;  %v2283_v43 = vmul.f32 -1.442695, %v614_v25 }
 0x30d   :  { %v2406_v29 = vpop.eup %2405  ;;  %v608_v30 = vpop.f32.mrf.mxu3 }
 0x30e   :  { %v615_v31 = vadd.f32 %v608_v30, %v272_v28  ;;  %683 = vrot.lane.b32.xlu1 %v2406_v29, %s2580_s15 }
 0x310   :  { %2407 = vtanh.f32 %v615_v31  ;;  %v2284_v40 = vmul.f32 -1.442695, %v615_v31 }
 0x315   :  { %v611_v34 = vpop.f32.mrf.mxu3 }
 0x316   :  { %v2408_v36 = vpop.eup %2407  ;;  %v616_v37 = vadd.f32 %v611_v34, %v274_v33 }
 0x317   :  { %685 = vrot.lane.b32.xlu2 %v2408_v36, %s2580_s15 }
 0x318   :  { %2409 = vtanh.f32 %v616_v37  ;;  %v2285_v52 = vmul.f32 -1.442695, %v616_v37 }
 0x319   :  { %2411 = vpow2.f32 %v2284_v40 }
 0x31e   :  { %v2410_v38 = vpop.eup %2409 }
 0x31f   :  { %687 = vrot.lane.b32.xlu0 %v2410_v38, %s2580_s15  ;;  %v2412_v41 = vpop.eup %2411 }
 0x320   :  { %v627_v42 = vadd.f32 1.0, %v2412_v41 }
 0x322   :  { %2413 = vrcp.f32 %v627_v42  ;;  %v655_v58 = vand.u32 2147483648, %v627_v42  ;;  %vm649_vm7 = vweird.f32 %v627_v42  ;;  %v653_v59 = vand.u32 2147483647, %v627_v42 }
 0x323   :  { %2415 = vpow2.f32 %v2283_v43 }
 0x324   :  { %v656_v2 = vor.u32 1.1754944e-38, %v655_v58  ;;  %vm654_vm9 = vcmp.eq.f32.partialorder %v653_v59, 8.507059e+37 }
 0x328   :  { %v2414_v44 = vpop.eup %2413 }
 0x329   :  { %v2416_v47 = vpop.eup %2415  ;;  %v645_v48 = vmul.f32 %v2414_v44, %v627_v42  ;;  %vm650_vm6 = vweird.f32 %v2414_v44 }
 0x32a   :  { %v626_v49 = vadd.f32 1.0, %v2416_v47  ;;  %vm651_vm8 = vmor %vm649_vm7, %vm650_vm6  ;;  %v2898_v47 = vsel %vm534_vm5, %v2808_v35, 0.0  ;;  %v2913_v35 = vsel %vm533_vm3, %v2819_v46, 0.0  ;;  %v2926_v46 = vsel %vm535_vm4, %v2811_v39, 0.0 }
 0x32b   :  { %v646_v51 = vsub.f32 1.0, %v645_v48 }
 0x32c   :  { %2417 = vrcp.f32 %v626_v49  ;;  %v640_v23 = vand.u32 2147483648, %v626_v49  ;;  %vm634_vm12 = vweird.f32 %v626_v49  ;;  %v638_v25 = vand.u32 2147483647, %v626_v49 }
 0x32d   :  { %v647_v53 = vmul.f32 %v2414_v44, %v646_v51  ;;  %2419 = vpow2.f32 %v2285_v52 }
 0x32e   :  { %v641_v28 = vor.u32 1.1754944e-38, %v640_v23  ;;  %vm639_vm14 = vcmp.eq.f32.partialorder %v638_v25, 8.507059e+37 }
 0x32f   :  { %v648_v56 = vadd.f32 %v2414_v44, %v647_v53  ;;  %v2288_v53 = vld [vmem:[%s3657_s2 + $0x28] sm:$0xff] }
 0x331   :  { %v652_v1 = vsel %vm651_vm8, %v2414_v44, %v648_v56  ;;  %vm734_vm8 = vcmp.ne.f32.partialorder %v2288_v53, 0.0 }
 0x332   :  { %v2418_v54 = vpop.eup %2417  ;;  %v2885_v7 = vsel %vm654_vm9, %v656_v2, %v652_v1  ;;  %v737_v60 = vsel %vm734_vm8, 1, %v2581_v45 }
 0x333   :  { %v630_v63 = vmul.f32 %v2418_v54, %v626_v49  ;;  %v2420_v0 = vpop.eup %2419  ;;  %vm635_vm11 = vweird.f32 %v2418_v54  ;;  %v678_v48 = vmul.f32 %v2885_v7, %v2898_v47 }
 0x334   :  { %v628_v4 = vadd.f32 1.0, %v2420_v0  ;;  %vm636_vm13 = vmor %vm634_vm12, %vm635_vm11 }
 0x335   :  { %v631_v9 = vsub.f32 1.0, %v630_v63  ;;  %v2287_v63 = vld [vmem:[%s3657_s2 + $0x20] sm:$0xff] }
 0x336   :  { %2421 = vrcp.f32 %v628_v4  ;;  %v670_v37 = vand.u32 2147483648, %v628_v4  ;;  %vm664_vm2 = vweird.f32 %v628_v4  ;;  %v668_v38 = vand.u32 2147483647, %v628_v4 }
 0x337   :  { %v632_v17 = vmul.f32 %v2418_v54, %v631_v9  ;;  %vm733_vm5 = vcmp.ne.f32.partialorder %v2287_v63, 0.0 }
 0x338   :  { %v671_v41 = vor.u32 1.1754944e-38, %v670_v37  ;;  %vm669_vm7 = vcmp.eq.f32.partialorder %v668_v38, 8.507059e+37  ;;  %v736_v50 = vsel %vm733_vm5, 1, %v2581_v45 }
 0x339   :  { %v633_v22 = vadd.f32 %v2418_v54, %v632_v17 }
 0x33b   :  { %v637_v27 = vsel %vm636_vm13, %v2418_v54, %v633_v22 }
 0x33c   :  { %v2422_v24 = vpop.eup %2421  ;;  %v642_v30 = vsel %vm639_vm14, %v641_v28, %v637_v27 }
 0x33d   :  { %v660_v29 = vmul.f32 %v2422_v24, %v628_v4  ;;  %vm665_vm15 = vweird.f32 %v2422_v24  ;;  %v677_v54 = vmul.f32 %v642_v30, %v2913_v35 }
 0x33e   :  { %vm666_vm6 = vmor %vm664_vm2, %vm665_vm15 }
 0x33f   :  { %v661_v33 = vsub.f32 1.0, %v660_v29 }
 0x341   :  { %v662_v34 = vmul.f32 %v2422_v24, %v661_v33 }
 0x343   :  { %v663_v36 = vadd.f32 %v2422_v24, %v662_v34 }
 0x345   :  { %v667_v40 = vsel %vm666_vm6, %v2422_v24, %v663_v36 }
 0x346   :  { %v672_v43 = vsel %vm669_vm7, %v671_v41, %v667_v40 }
 0x347   :  { %v679_v0 = vmul.f32 %v672_v43, %v2926_v46 }
 0x371   :  { %v686_v6 = vpop.permute.xlu2 %685 }
 0x372   :  { %v693_v11 = vmul.f32 %v686_v6, %v2885_v7 }
 0x374   :  { %700 = vrot.lane.b32.xlu2 %v693_v11, %s2580_s15 }
 0x37c   :  { %739 = vperm.xlu2 %2376, %v735_v21  }
 0x380   :  { %v684_v31 = vpop.permute.xlu1 %683 }
 0x381   :  { %v692_v32 = vmul.f32 %v684_v31, %v642_v30 }
 0x383   :  { %698 = vrot.lane.b32.xlu1 %v692_v32, %s2580_s15 }
 0x391   :  { %v688_v42 = vpop.permute.xlu0 %687 }
 0x392   :  { %v694_v44 = vmul.f32 %v688_v42, %v672_v43 }
 0x394   :  { %702 = vrot.lane.b32.xlu0 %v694_v44, %s2580_s15 }
 0x3ce   :  { %v701_v49 = vpop.permute.xlu2 %700 }
 0x3cf   :  { %v2902_v51 = vadd.f32 %v701_v49, %v678_v48 }
 0x3d1   :  { %2423 = vtanh.f32 %v2902_v51 }
 0x3d6   :  { %v2934_v6 = vpop.permute.xlu2 %739 }
 0x3d7   :  { %v2424_v52 = vpop.eup %2423  ;;  %vm747_vm3 = vcmp.eq.s32.totalorder %v2934_v6, 1 }
 0x3d8   :  { %718 = vrot.lane.b32.xlu0 %v2424_v52, %s2580_s15 }
 0x3e0   :  { %745 = vperm.xlu0 %2375, %v737_v60  }
 0x3f5   :  { %v699_v56 = vpop.permute.xlu1 %698 }
 0x3f6   :  { %v2916_v58 = vadd.f32 %v699_v56, %v677_v54 }
 0x3f8   :  { %2425 = vtanh.f32 %v2916_v58 }
 0x3fe   :  { %v2426_v59 = vpop.eup %2425 }
 0x3ff   :  { %716 = vrot.lane.b32.xlu1 %v2426_v59, %s2580_s15 }
 0x406   :  { %v703_v1 = vpop.permute.xlu0 %702 }
 0x407   :  { %v2930_v2 = vadd.f32 %v703_v1, %v679_v0  ;;  %742 = vperm.xlu1 %2374, %v736_v50  }
 0x409   :  { %2427 = vtanh.f32 %v2930_v2 }
 0x40f   :  { %v2428_v4 = vpop.eup %2427 }
 0x410   :  { %720 = vrot.lane.b32.xlu2 %v2428_v4, %s2580_s15 }
 0x44a   :  { %v719_v9 = vpop.permute.xlu0 %718 }
 0x44b   :  { %v726_v23 = vmul.f32 %v719_v9, %v2885_v7 }
 0x452   :  { %v2945_v21 = vpop.permute.xlu0 %745 }
 0x453   :  { %vm749_vm4 = vcmp.eq.s32.totalorder %v2945_v21, 1 }
 0x46a   :  { %v721_v39 = vpop.permute.xlu2 %720 }
 0x46b   :  { %v727_v22 = vmul.f32 %v721_v39, %v672_v43 }
 0x471   :  { %v717_v11 = vpop.permute.xlu1 %716 }
 0x472   :  { %v725_v57 = vmul.f32 %v717_v11, %v642_v30 }
 0x474   :  { %v2940_v13 = vsel %vm747_vm3, %v725_v57, %v2833_v55  ;;  %v2955_v55 = vsel %vm749_vm4, %v727_v22, %v2846_v61  ;;  %v2349_v61 = vld [vmem:[%s3655_s0 + $0x8] sm:$0xff] }
 0x475   :  { %769 = vrot.lane.b32.xlu1 %v2940_v13, %s2582_s22  ;;  %v763_v17 = vmul.f32 0.0, %v2940_v13  ;;  %v762_v7 = vmul.f32 0.0, %v2955_v55  ;;  %2226 = vmatmul.msk.bf16.gmra.mxu0 %vm114_vm1, %v2349_v61 }
 0x477   :  { %781 = vrot.lane.b32.xlu2 %v763_v17, %s2583_s23 }
 0x479   :  { %v2950_v24 = vpop.permute.xlu1 %742 }
 0x47a   :  { %vm748_vm9 = vcmp.eq.s32.totalorder %v2950_v24, 1 }
 0x47b   :  { %v2961_v25 = vsel %vm748_vm9, %v726_v23, %v2851_v62  ;;  %v2358_v62 = vld [vmem:[%s3653_s1 + $0x10] sm:$0xff] }
 0x47c   :  { %v761_v27 = vmul.f32 0.0, %v2961_v25  ;;  %2271 = vmatmul.msk.bf16.gmra.mxu1 %vm232_vm0, %v2358_v62 }
 0x47d   :  { %783 = vrot.lane.b32.xlu1 %v2961_v25, %s2583_s23 }
 0x47e   :  { %771 = vrot.lane.b32.xlu0 %v761_v27, %s2582_s22 }
 0x47f   :  { %773 = vrot.lane.b32.xlu2 %v762_v7, %s2582_s22 }
 0x486   :  { %785 = vrot.lane.b32.xlu0 %v2955_v55, %s2583_s23 }
 0x4d1   :  { %v782_v28 = vpop.permute.xlu2 %781 }
 0x4d9   :  { %v774_v34 = vpop.permute.xlu2 %773 }
 0x4e7   :  { %v770_v29 = vpop.permute.xlu1 %769 }
 0x4e8   :  { %v790_v30 = vsel %vm232_vm0, %v770_v29, %v782_v28  ;;  %v2295_v29 = vld [vmem:[%s3657_s2 + $0x30] sm:$0xff] }
 0x4e9   :  { %2289 = vmatmul.msk.f32.vlgmr.msra.gmra.mxu2 %vm114_vm1, %v790_v30  ;;  %vm946_vm14 = vcmp.ne.f32.partialorder %v2295_v29, 0.0 }
 0x4ea   :  { %1880 = vmatpush.msra.mxu2 %v2672_v3 }
 0x4ec   :  { %1881 = vmatpush.msra.mxu2 %v2681_v5 }
 0x4ee   :  { %1882 = vmatpush.msra.mxu2 %v2694_v8 }
 0x4ef   :  { %v784_v31 = vpop.permute.xlu1 %783 }
 0x4f0   :  { %v772_v32 = vpop.permute.xlu0 %771  ;;  %1883 = vmatpush.msra.mxu2 %v2705_v10 }
 0x4f1   :  { %v791_v33 = vsel %vm232_vm0, %v772_v32, %v784_v31  ;;  %v949_v31 = vsel %vm946_vm14, 1, %v2581_v45 }
 0x4f2   :  { %2290 = vmatmul.msk.f32.gmra.mxu2 %vm114_vm1, %v791_v33  ;;  %v141_v8 = vpop.f32.mrf.mxu0 }
 0x4f3   :  { %1884 = vmatpush.msra.mxu2 %v2716_v12  ;;  %v142_v10 = vadd.f32 %v2785_v20, %v141_v8 }
 0x4f5   :  { %1885 = vmatpush.msra.mxu2 %v2726_v14 }
 0x4f7   :  { %1886 = vmatpush.msra.mxu2 %v2734_v15 }
 0x4f8   :  { %v786_v3 = vpop.permute.xlu0 %785 }
 0x4f9   :  { %v792_v5 = vsel %vm232_vm0, %v774_v34, %v786_v3  ;;  %1887 = vmatpush.msra.mxu2 %v2742_v16  ;;  %v276_v38 = vpop.f32.mrf.mxu1 }
 0x4fa   :  { %2291 = vmatmul.msk.f32.gmra.mxu2 %vm114_vm1, %v792_v5  ;;  %v277_v12 = vadd.f32 %v2791_v26, %v276_v38 }
 0x501   :  { %v278_v41 = vpop.f32.mrf.mxu1 }
 0x502   :  { %v279_v16 = vadd.f32 %v2791_v26, %v278_v41 }
 0x56c   :  { %v819_v36 = vpop.f32.mrf.mxu2 }
 0x56d   :  { %v828_v37 = vadd.f32 %v819_v36, %v142_v10 }
 0x56f   :  { %2429 = vtanh.f32 %v828_v37  ;;  %v2292_v60 = vmul.f32 -1.442695, %v828_v37 }
 0x575   :  { %v2430_v14 = vpop.eup %2429  ;;  %v822_v40 = vpop.f32.mrf.mxu2 }
 0x576   :  { %v829_v15 = vadd.f32 %v822_v40, %v277_v12  ;;  %897 = vrot.lane.b32.xlu1 %v2430_v14, %s2580_s15 }
 0x578   :  { %2431 = vtanh.f32 %v829_v15  ;;  %v2293_v49 = vmul.f32 -1.442695, %v829_v15 }
 0x57d   :  { %v825_v42 = vpop.f32.mrf.mxu2 }
 0x57e   :  { %v2432_v43 = vpop.eup %2431  ;;  %v830_v44 = vadd.f32 %v825_v42, %v279_v16 }
 0x57f   :  { %899 = vrot.lane.b32.xlu2 %v2432_v43, %s2580_s15 }
 0x580   :  { %2433 = vtanh.f32 %v830_v44  ;;  %v2294_v0 = vmul.f32 -1.442695, %v830_v44 }
 0x581   :  { %2435 = vpow2.f32 %v2293_v49  ;;  %v3013_v49 = vsel %vm748_vm9, %v2902_v51, %v2898_v47  ;;  %v3029_v47 = vsel %vm747_vm3, %v2916_v58, %v2913_v35  ;;  %v3043_v35 = vsel %vm749_vm4, %v2930_v2, %v2926_v46 }
 0x586   :  { %v2434_v48 = vpop.eup %2433 }
 0x587   :  { %901 = vrot.lane.b32.xlu0 %v2434_v48, %s2580_s15  ;;  %v2436_v52 = vpop.eup %2435 }
 0x588   :  { %v841_v53 = vadd.f32 1.0, %v2436_v52 }
 0x58a   :  { %2437 = vrcp.f32 %v841_v53  ;;  %v869_v11 = vand.u32 2147483648, %v841_v53  ;;  %vm863_vm11 = vweird.f32 %v841_v53  ;;  %v867_v57 = vand.u32 2147483647, %v841_v53 }
 0x58b   :  { %2439 = vpow2.f32 %v2292_v60 }
 0x58c   :  { %v870_v23 = vor.u32 1.1754944e-38, %v869_v11  ;;  %vm868_vm13 = vcmp.eq.f32.partialorder %v867_v57, 8.507059e+37 }
 0x590   :  { %v2438_v54 = vpop.eup %2437 }
 0x591   :  { %v2440_v56 = vpop.eup %2439  ;;  %v859_v59 = vmul.f32 %v2438_v54, %v841_v53  ;;  %vm864_vm10 = vweird.f32 %v2438_v54 }
 0x592   :  { %v840_v63 = vadd.f32 1.0, %v2440_v56  ;;  %vm865_vm12 = vmor %vm863_vm11, %vm864_vm10  ;;  %v2297_v56 = vld [vmem:[%s3657_s2 + $0x40] sm:$0xff] }
 0x593   :  { %v860_v50 = vsub.f32 1.0, %v859_v59 }
 0x594   :  { %2441 = vrcp.f32 %v840_v63  ;;  %v854_v33 = vand.u32 2147483648, %v840_v63  ;;  %vm848_vm2 = vweird.f32 %v840_v63  ;;  %v852_v3 = vand.u32 2147483647, %v840_v63 }
 0x595   :  { %v861_v1 = vmul.f32 %v2438_v54, %v860_v50  ;;  %2443 = vpow2.f32 %v2294_v0  ;;  %v2296_v0 = vld [vmem:[%s3657_s2 + $0x38] sm:$0xff] }
 0x596   :  { %v855_v8 = vor.u32 1.1754944e-38, %v854_v33  ;;  %vm853_vm7 = vcmp.eq.f32.partialorder %v852_v3, 8.507059e+37  ;;  %vm947_vm9 = vcmp.ne.f32.partialorder %v2296_v0, 0.0 }
 0x597   :  { %v862_v9 = vadd.f32 %v2438_v54, %v861_v1  ;;  %v950_v58 = vsel %vm947_vm9, 1, %v2581_v45 }
 0x599   :  { %v866_v22 = vsel %vm865_vm12, %v2438_v54, %v862_v9  ;;  %vm948_vm12 = vcmp.ne.f32.partialorder %v2297_v56, 0.0 }
 0x59a   :  { %v2442_v4 = vpop.eup %2441  ;;  %v2999_v7 = vsel %vm868_vm13, %v870_v23, %v866_v22  ;;  %v951_v24 = vsel %vm948_vm12, 1, %v2581_v45 }
 0x59b   :  { %v844_v39 = vmul.f32 %v2442_v4, %v840_v63  ;;  %v2444_v17 = vpop.eup %2443  ;;  %vm849_vm15 = vweird.f32 %v2442_v4  ;;  %v892_v52 = vmul.f32 %v2999_v7, %v3013_v49 }
 0x59c   :  { %v842_v27 = vadd.f32 1.0, %v2444_v17  ;;  %vm850_vm6 = vmor %vm848_vm2, %vm849_vm15 }
 0x59d   :  { %v845_v62 = vsub.f32 1.0, %v844_v39 }
 0x59e   :  { %2445 = vrcp.f32 %v842_v27  ;;  %v884_v15 = vand.u32 2147483648, %v842_v27  ;;  %vm878_vm5 = vweird.f32 %v842_v27  ;;  %v882_v41 = vand.u32 2147483647, %v842_v27 }
 0x59f   :  { %v846_v30 = vmul.f32 %v2442_v4, %v845_v62 }
 0x5a0   :  { %v885_v42 = vor.u32 1.1754944e-38, %v884_v15  ;;  %vm883_vm11 = vcmp.eq.f32.partialorder %v882_v41, 8.507059e+37 }
 0x5a1   :  { %v847_v32 = vadd.f32 %v2442_v4, %v846_v30 }
 0x5a3   :  { %v851_v5 = vsel %vm850_vm6, %v2442_v4, %v847_v32 }
 0x5a4   :  { %v2446_v34 = vpop.eup %2445  ;;  %v856_v37 = vsel %vm853_vm7, %v855_v8, %v851_v5  ;;  %v143_v8 = vpop.f32.mrf.mxu0 }
 0x5a5   :  { %v874_v10 = vmul.f32 %v2446_v34, %v842_v27  ;;  %vm879_vm8 = vweird.f32 %v2446_v34  ;;  %v891_v51 = vmul.f32 %v856_v37, %v3029_v47 }
 0x5a6   :  { %vm880_vm10 = vmor %vm878_vm5, %vm879_vm8 }
 0x5a7   :  { %v875_v12 = vsub.f32 1.0, %v874_v10  ;;  %v144_v10 = vadd.f32 %v2785_v20, %v143_v8 }
 0x5a9   :  { %v876_v14 = vmul.f32 %v2446_v34, %v875_v12 }
 0x5ab   :  { %v877_v40 = vadd.f32 %v2446_v34, %v876_v14 }
 0x5ad   :  { %v881_v16 = vsel %vm880_vm10, %v2446_v34, %v877_v40 }
 0x5ae   :  { %v886_v44 = vsel %vm883_vm11, %v885_v42, %v881_v16 }
 0x5af   :  { %v893_v6 = vmul.f32 %v886_v44, %v3043_v35 }
 0x5d9   :  { %v900_v61 = vpop.permute.xlu2 %899 }
 0x5da   :  { %v907_v28 = vmul.f32 %v900_v61, %v2999_v7 }
 0x5dc   :  { %914 = vrot.lane.b32.xlu2 %v907_v28, %s2580_s15 }
 0x5e4   :  { %953 = vperm.xlu2 %2376, %v949_v31  }
 0x5e8   :  { %v898_v36 = vpop.permute.xlu1 %897 }
 0x5e9   :  { %v906_v38 = vmul.f32 %v898_v36, %v856_v37 }
 0x5eb   :  { %912 = vrot.lane.b32.xlu1 %v906_v38, %s2580_s15 }
 0x5f9   :  { %v902_v43 = vpop.permute.xlu0 %901 }
 0x5fa   :  { %v908_v48 = vmul.f32 %v902_v43, %v886_v44 }
 0x5fc   :  { %916 = vrot.lane.b32.xlu0 %v908_v48, %s2580_s15 }
 0x636   :  { %v915_v53 = vpop.permute.xlu2 %914 }
 0x637   :  { %v3017_v60 = vadd.f32 %v915_v53, %v892_v52 }
 0x639   :  { %2447 = vtanh.f32 %v3017_v60 }
 0x63e   :  { %v3051_v11 = vpop.permute.xlu2 %953 }
 0x63f   :  { %v2448_v54 = vpop.eup %2447  ;;  %vm961_vm3 = vcmp.eq.s32.totalorder %v3051_v11, 1 }
 0x640   :  { %932 = vrot.lane.b32.xlu0 %v2448_v54, %s2580_s15 }
 0x648   :  { %959 = vperm.xlu0 %2375, %v951_v24  }
 0x65d   :  { %v913_v59 = vpop.permute.xlu1 %912 }
 0x65e   :  { %v3032_v63 = vadd.f32 %v913_v59, %v891_v51 }
 0x660   :  { %2449 = vtanh.f32 %v3032_v63 }
 0x666   :  { %v2450_v50 = vpop.eup %2449 }
 0x667   :  { %930 = vrot.lane.b32.xlu1 %v2450_v50, %s2580_s15 }
 0x66e   :  { %v917_v1 = vpop.permute.xlu0 %916 }
 0x66f   :  { %v3047_v4 = vadd.f32 %v917_v1, %v893_v6  ;;  %956 = vperm.xlu1 %2374, %v950_v58  }
 0x671   :  { %2451 = vtanh.f32 %v3047_v4 }
 0x677   :  { %v2452_v9 = vpop.eup %2451 }
 0x678   :  { %934 = vrot.lane.b32.xlu2 %v2452_v9, %s2580_s15 }
 0x6b2   :  { %v933_v57 = vpop.permute.xlu0 %932 }
 0x6b3   :  { %v940_v27 = vmul.f32 %v933_v57, %v2999_v7 }
 0x6ba   :  { %v3062_v22 = vpop.permute.xlu0 %959 }
 0x6bb   :  { %vm963_vm4 = vcmp.eq.s32.totalorder %v3062_v22, 1 }
 0x6d2   :  { %v935_v46 = vpop.permute.xlu2 %934 }
 0x6d3   :  { %v941_v23 = vmul.f32 %v935_v46, %v886_v44 }
 0x6d9   :  { %v931_v39 = vpop.permute.xlu1 %930 }
 0x6da   :  { %v939_v21 = vmul.f32 %v931_v39, %v856_v37 }
 0x6dc   :  { %v3057_v2 = vsel %vm961_vm3, %v939_v21, %v2940_v13  ;;  %v3072_v13 = vsel %vm963_vm4, %v941_v23, %v2955_v55  ;;  %v2359_v55 = vld [vmem:[%s3653_s1 + $0x18] sm:$0xff] }
 0x6dd   :  { %983 = vrot.lane.b32.xlu1 %v3057_v2, %s2582_s22  ;;  %v977_v17 = vmul.f32 0.0, %v3057_v2  ;;  %v976_v7 = vmul.f32 0.0, %v3072_v13  ;;  %2272 = vmatmul.msk.bf16.gmra.mxu1 %vm232_vm0, %v2359_v55  ;;  %v2304_v55 = vld [vmem:[%s3657_s2 + $0x48] sm:$0xff] }
 0x6de   :  { %vm1160_vm7 = vcmp.ne.f32.partialorder %v2304_v55, 0.0 }
 0x6df   :  { %995 = vrot.lane.b32.xlu2 %v977_v17, %s2583_s23 }
 0x6e1   :  { %v3067_v61 = vpop.permute.xlu1 %956 }
 0x6e2   :  { %vm962_vm13 = vcmp.eq.s32.totalorder %v3067_v61, 1 }
 0x6e3   :  { %v3078_v62 = vsel %vm962_vm13, %v940_v27, %v2961_v25 }
 0x6e4   :  { %v975_v28 = vmul.f32 0.0, %v3078_v62 }
 0x6e5   :  { %997 = vrot.lane.b32.xlu1 %v3078_v62, %s2583_s23 }
 0x6e6   :  { %985 = vrot.lane.b32.xlu0 %v975_v28, %s2582_s22 }
 0x6e7   :  { %987 = vrot.lane.b32.xlu2 %v976_v7, %s2582_s22 }
 0x6ee   :  { %999 = vrot.lane.b32.xlu0 %v3072_v13, %s2583_s23 }
 0x739   :  { %v996_v25 = vpop.permute.xlu2 %995 }
 0x741   :  { %v988_v34 = vpop.permute.xlu2 %987 }
 0x74f   :  { %v984_v29 = vpop.permute.xlu1 %983 }
 0x750   :  { %v1004_v30 = vsel %vm232_vm0, %v984_v29, %v996_v25  ;;  %v1163_v29 = vsel %vm1160_vm7, 1, %v2581_v45 }
 0x751   :  { %2298 = vmatmul.msk.f32.vlgmr.msrb.gmra.mxu3 %vm114_vm1, %v1004_v30 }
 0x757   :  { %v998_v31 = vpop.permute.xlu1 %997 }
 0x758   :  { %v986_v32 = vpop.permute.xlu0 %985 }
 0x759   :  { %v1005_v33 = vsel %vm232_vm0, %v986_v32, %v998_v31 }
 0x75a   :  { %2299 = vmatmul.msk.f32.gmra.mxu3 %vm114_vm1, %v1005_v33  ;;  %v281_v38 = vpop.f32.mrf.mxu1 }
 0x75b   :  { %v282_v12 = vadd.f32 %v2791_v26, %v281_v38 }
 0x760   :  { %v1000_v3 = vpop.permute.xlu0 %999 }
 0x761   :  { %v1006_v5 = vsel %vm232_vm0, %v988_v34, %v1000_v3 }
 0x762   :  { %2300 = vmatmul.msk.f32.gmra.mxu3 %vm114_vm1, %v1006_v5  ;;  %v283_v41 = vpop.f32.mrf.mxu1 }
 0x763   :  { %v284_v16 = vadd.f32 %v2791_v26, %v283_v41 }
 0x7d4   :  { %v1033_v36 = vpop.f32.mrf.mxu3 }
 0x7d5   :  { %v1042_v37 = vadd.f32 %v1033_v36, %v144_v10 }
 0x7d7   :  { %2453 = vtanh.f32 %v1042_v37  ;;  %v2301_v54 = vmul.f32 -1.442695, %v1042_v37 }
 0x7dd   :  { %v2454_v14 = vpop.eup %2453  ;;  %v1036_v40 = vpop.f32.mrf.mxu3 }
 0x7de   :  { %v1043_v15 = vadd.f32 %v1036_v40, %v282_v12  ;;  %1111 = vrot.lane.b32.xlu1 %v2454_v14, %s2580_s15 }
 0x7e0   :  { %2455 = vtanh.f32 %v1043_v15  ;;  %v2302_v48 = vmul.f32 -1.442695, %v1043_v15 }
 0x7e5   :  { %v1039_v42 = vpop.f32.mrf.mxu3 }
 0x7e6   :  { %v2456_v43 = vpop.eup %2455  ;;  %v1044_v44 = vadd.f32 %v1039_v42, %v284_v16 }
 0x7e7   :  { %1113 = vrot.lane.b32.xlu2 %v2456_v43, %s2580_s15 }
 0x7e8   :  { %2457 = vtanh.f32 %v1044_v44  ;;  %v2303_v50 = vmul.f32 -1.442695, %v1044_v44  ;;  %v3118_v44 = vsel %vm962_vm13, %v3017_v60, %v3013_v49  ;;  %v3134_v49 = vsel %vm961_vm3, %v3032_v63, %v3029_v47 }
 0x7e9   :  { %2459 = vpow2.f32 %v2302_v48  ;;  %v3148_v47 = vsel %vm963_vm4, %v3047_v4, %v3043_v35 }
 0x7ee   :  { %v2458_v20 = vpop.eup %2457 }
 0x7ef   :  { %1115 = vrot.lane.b32.xlu0 %v2458_v20, %s2580_s15  ;;  %v2460_v52 = vpop.eup %2459 }
 0x7f0   :  { %v1055_v53 = vadd.f32 1.0, %v2460_v52 }
 0x7f2   :  { %2461 = vrcp.f32 %v1055_v53  ;;  %v1083_v1 = vand.u32 2147483648, %v1055_v53  ;;  %vm1077_vm15 = vweird.f32 %v1055_v53  ;;  %v1081_v9 = vand.u32 2147483647, %v1055_v53 }
 0x7f3   :  { %2463 = vpow2.f32 %v2301_v54  ;;  %v2306_v54 = vld [vmem:[%s3657_s2 + $0x58] sm:$0xff] }
 0x7f4   :  { %v1084_v46 = vor.u32 1.1754944e-38, %v1083_v1  ;;  %vm1082_vm6 = vcmp.eq.f32.partialorder %v1081_v9, 8.507059e+37 }
 0x7f8   :  { %v2462_v56 = vpop.eup %2461 }
 0x7f9   :  { %v2464_v24 = vpop.eup %2463  ;;  %v1073_v51 = vmul.f32 %v2462_v56, %v1055_v53  ;;  %vm1078_vm14 = vweird.f32 %v2462_v56 }
 0x7fa   :  { %v1054_v26 = vadd.f32 1.0, %v2464_v24  ;;  %vm1079_vm2 = vmor %vm1077_vm15, %vm1078_vm14 }
 0x7fb   :  { %v1074_v59 = vsub.f32 1.0, %v1073_v51 }
 0x7fc   :  { %2465 = vrcp.f32 %v1054_v26  ;;  %v1068_v31 = vand.u32 2147483648, %v1054_v26  ;;  %vm1062_vm5 = vweird.f32 %v1054_v26  ;;  %v1066_v33 = vand.u32 2147483647, %v1054_v26 }
 0x7fd   :  { %v1075_v0 = vmul.f32 %v2462_v56, %v1074_v59  ;;  %2467 = vpow2.f32 %v2303_v50 }
 0x7fe   :  { %v1069_v3 = vor.u32 1.1754944e-38, %v1068_v31  ;;  %vm1067_vm11 = vcmp.eq.f32.partialorder %v1066_v33, 8.507059e+37 }
 0x7ff   :  { %v1076_v6 = vadd.f32 %v2462_v56, %v1075_v0 }
 0x801   :  { %v1080_v21 = vsel %vm1079_vm2, %v2462_v56, %v1076_v6  ;;  %vm1162_vm2 = vcmp.ne.f32.partialorder %v2306_v54, 0.0 }
 0x802   :  { %v2466_v58 = vpop.eup %2465  ;;  %v3104_v23 = vsel %vm1082_vm6, %v1084_v46, %v1080_v21  ;;  %v1165_v61 = vsel %vm1162_vm2, 1, %v2581_v45 }
 0x803   :  { %v1058_v57 = vmul.f32 %v2466_v58, %v1054_v26  ;;  %v2468_v39 = vpop.eup %2467  ;;  %vm1063_vm8 = vweird.f32 %v2466_v58  ;;  %v1106_v20 = vmul.f32 %v3104_v23, %v3118_v44  ;;  %v2305_v26 = vld [vmem:[%s3657_s2 + $0x50] sm:$0xff] }
 0x804   :  { %v1056_v17 = vadd.f32 1.0, %v2468_v39  ;;  %vm1064_vm10 = vmor %vm1062_vm5, %vm1063_vm8  ;;  %vm1161_vm13 = vcmp.ne.f32.partialorder %v2305_v26, 0.0 }
 0x805   :  { %v1059_v28 = vsub.f32 1.0, %v1058_v57  ;;  %v1164_v63 = vsel %vm1161_vm13, 1, %v2581_v45 }
 0x806   :  { %2469 = vrcp.f32 %v1056_v17  ;;  %v1098_v14 = vand.u32 2147483648, %v1056_v17  ;;  %vm1092_vm9 = vweird.f32 %v1056_v17  ;;  %v1096_v40 = vand.u32 2147483647, %v1056_v17 }
 0x807   :  { %v1060_v25 = vmul.f32 %v2466_v58, %v1059_v28 }
 0x808   :  { %v1099_v41 = vor.u32 1.1754944e-38, %v1098_v14  ;;  %vm1097_vm15 = vcmp.eq.f32.partialorder %v1096_v40, 8.507059e+37 }
 0x809   :  { %v1061_v30 = vadd.f32 %v2466_v58, %v1060_v25 }
 0x80b   :  { %v1065_v34 = vsel %vm1064_vm10, %v2466_v58, %v1061_v30 }
 0x80c   :  { %v2470_v32 = vpop.eup %2469  ;;  %v1070_v10 = vsel %vm1067_vm11, %v1069_v3, %v1065_v34  ;;  %v3210_v3 = vld [vmem:[%s3656_s4] ss:$0 sm:$0xff] }
 0x80d   :  { %v1088_v5 = vmul.f32 %v2470_v32, %v1056_v17  ;;  %vm1093_vm12 = vweird.f32 %v2470_v32  ;;  %v1105_v60 = vmul.f32 %v1070_v10, %v3134_v49 }
 0x80e   :  { %vm1094_vm14 = vmor %vm1092_vm9, %vm1093_vm12 }
 0x80f   :  { %v1089_v37 = vsub.f32 1.0, %v1088_v5 }
 0x811   :  { %v1090_v38 = vmul.f32 %v2470_v32, %v1089_v37  ;;  %v3216_v37 = vld [vmem:[%s3654_s6] ss:$0 sm:$0xff] }
 0x813   :  { %v1091_v12 = vadd.f32 %v2470_v32, %v1090_v38 }
 0x815   :  { %v1095_v15 = vsel %vm1094_vm14, %v2470_v32, %v1091_v12 }
 0x816   :  { %v1100_v42 = vsel %vm1097_vm15, %v1099_v41, %v1095_v15 }
 0x817   :  { %v1107_v11 = vmul.f32 %v1100_v42, %v3148_v47 }
 0x841   :  { %v1114_v27 = vpop.permute.xlu2 %1113 }
 0x842   :  { %v1121_v7 = vmul.f32 %v1114_v27, %v3104_v23 }
 0x844   :  { %1128 = vrot.lane.b32.xlu2 %v1121_v7, %s2580_s15 }
 0x84c   :  { %1167 = vperm.xlu2 %2376, %v1163_v29  }
 0x850   :  { %v1112_v8 = vpop.permute.xlu1 %1111 }
 0x851   :  { %v1120_v36 = vmul.f32 %v1112_v8, %v1070_v10 }
 0x853   :  { %1126 = vrot.lane.b32.xlu1 %v1120_v36, %s2580_s15 }
 0x861   :  { %v1116_v16 = vpop.permute.xlu0 %1115 }
 0x862   :  { %v1122_v43 = vmul.f32 %v1116_v16, %v1100_v42 }
 0x864   :  { %1130 = vrot.lane.b32.xlu0 %v1122_v43, %s2580_s15 }
 0x89e   :  { %v1129_v48 = vpop.permute.xlu2 %1128 }
 0x89f   :  { %v3122_v52 = vadd.f32 %v1129_v48, %v1106_v20 }
 0x8a1   :  { %2471 = vtanh.f32 %v3122_v52 }
 0x8a6   :  { %v3156_v58 = vpop.permute.xlu2 %1167 }
 0x8a7   :  { %v2472_v53 = vpop.eup %2471  ;;  %vm1175_vm3 = vcmp.eq.s32.totalorder %v3156_v58, 1 }
 0x8a8   :  { %1146 = vrot.lane.b32.xlu0 %v2472_v53, %s2580_s15 }
 0x8b0   :  { %1173 = vperm.xlu0 %2375, %v1165_v61  }
 0x8c5   :  { %v1127_v56 = vpop.permute.xlu1 %1126 }
 0x8c6   :  { %v3137_v24 = vadd.f32 %v1127_v56, %v1105_v60 }
 0x8c8   :  { %2473 = vtanh.f32 %v3137_v24 }
 0x8ce   :  { %v2474_v51 = vpop.eup %2473 }
 0x8cf   :  { %1144 = vrot.lane.b32.xlu1 %v2474_v51, %s2580_s15 }
 0x8d6   :  { %v1131_v59 = vpop.permute.xlu0 %1130 }
 0x8d7   :  { %v3152_v50 = vadd.f32 %v1131_v59, %v1107_v11  ;;  %1170 = vperm.xlu1 %2374, %v1164_v63  }
 0x8d9   :  { %2475 = vtanh.f32 %v3152_v50 }
 0x8df   :  { %v2476_v0 = vpop.eup %2475 }
 0x8e0   :  { %1148 = vrot.lane.b32.xlu2 %v2476_v0, %s2580_s15 }
 0x91a   :  { %v1147_v6 = vpop.permute.xlu0 %1146 }
 0x91b   :  { %v1154_v21 = vmul.f32 %v1147_v6, %v3104_v23 }
 0x922   :  { %v3167_v57 = vpop.permute.xlu0 %1173 }
 0x923   :  { %vm1177_vm4 = vcmp.eq.s32.totalorder %v3167_v57, 1 }
 0x93a   :  { %v1149_v35 = vpop.permute.xlu2 %1148 }
 0x93b   :  { %v1155_v39 = vmul.f32 %v1149_v35, %v1100_v42 }
 0x941   :  { %v1145_v1 = vpop.permute.xlu1 %1144 }
 0x942   :  { %v1153_v22 = vmul.f32 %v1145_v1, %v1070_v10 }
 0x944   :  { %v3162_v4 = vsel %vm1175_vm3, %v1153_v22, %v3057_v2  ;;  %v3177_v2 = vsel %vm1177_vm4, %v1155_v39, %v3072_v13  ;;  %v2350_v13 = vld [vmem:[%s3655_s0 + $0x10] sm:$0xff] }
 0x945   :  { %1197 = vrot.lane.b32.xlu1 %v3162_v4, %s2582_s22  ;;  %v1191_v9 = vmul.f32 0.0, %v3162_v4  ;;  %v1190_v23 = vmul.f32 0.0, %v3177_v2  ;;  %2227 = vmatmul.msk.bf16.gmra.mxu0 %vm114_vm1, %v2350_v13 }
 0x947   :  { %1209 = vrot.lane.b32.xlu2 %v1191_v9, %s2583_s23 }
 0x949   :  { %v3172_v46 = vpop.permute.xlu1 %1170 }
 0x94a   :  { %vm1176_vm6 = vcmp.eq.s32.totalorder %v3172_v46, 1 }
 0x94b   :  { %v3183_v17 = vsel %vm1176_vm6, %v1154_v21, %v3078_v62  ;;  %v2360_v62 = vld [vmem:[%s3653_s1 + $0x20] sm:$0xff] }
 0x94c   :  { %v1189_v27 = vmul.f32 0.0, %v3183_v17  ;;  %2273 = vmatmul.msk.bf16.gmra.mxu1 %vm232_vm0, %v2360_v62 }
 0x94d   :  { %1211 = vrot.lane.b32.xlu1 %v3183_v17, %s2583_s23 }
 0x94e   :  { %1199 = vrot.lane.b32.xlu0 %v1189_v27, %s2582_s22 }
 0x94f   :  { %1201 = vrot.lane.b32.xlu2 %v1190_v23, %s2582_s22 }
 0x956   :  { %1213 = vrot.lane.b32.xlu0 %v3177_v2, %s2583_s23 }
 0x9a1   :  { %v1210_v28 = vpop.permute.xlu2 %1209 }
 0x9a9   :  { %v1202_v31 = vpop.permute.xlu2 %1201 }
 0x9b7   :  { %v1198_v7 = vpop.permute.xlu1 %1197 }
 0x9b8   :  { %v1218_v55 = vsel %vm232_vm0, %v1198_v7, %v1210_v28  ;;  %v2313_v7 = vld [vmem:[%s3657_s2 + $0x60] sm:$0xff] }
 0x9b9   :  { %2307 = vmatmul.msk.f32.vlgmr.msrb.gmra.mxu2 %vm114_vm1, %v1218_v55  ;;  %vm1374_vm11 = vcmp.ne.f32.partialorder %v2313_v7, 0.0 }
 0x9bf   :  { %v1212_v25 = vpop.permute.xlu1 %1211 }
 0x9c0   :  { %v1200_v29 = vpop.permute.xlu0 %1199 }
 0x9c1   :  { %v1219_v30 = vsel %vm232_vm0, %v1200_v29, %v1212_v25  ;;  %v1377_v25 = vsel %vm1374_vm11, 1, %v2581_v45 }
 0x9c2   :  { %2308 = vmatmul.msk.f32.gmra.mxu2 %vm114_vm1, %v1219_v30  ;;  %v146_v34 = vpop.f32.mrf.mxu0 }
 0x9c3   :  { %v147_v5 = vadd.f32 %v3210_v3, %v146_v34 }
 0x9c8   :  { %v1214_v32 = vpop.permute.xlu0 %1213 }
 0x9c9   :  { %v1220_v33 = vsel %vm232_vm0, %v1202_v31, %v1214_v32  ;;  %v286_v36 = vpop.f32.mrf.mxu1 }
 0x9ca   :  { %2309 = vmatmul.msk.f32.gmra.mxu2 %vm114_vm1, %v1220_v33  ;;  %v287_v38 = vadd.f32 %v3216_v37, %v286_v36 }
 0x9d1   :  { %v288_v15 = vpop.f32.mrf.mxu1 }
 0x9d2   :  { %v289_v41 = vadd.f32 %v3216_v37, %v288_v15 }
 0xa3c   :  { %v1247_v8 = vpop.f32.mrf.mxu2 }
 0xa3d   :  { %v1256_v10 = vadd.f32 %v1247_v8, %v147_v5 }
 0xa3f   :  { %2477 = vtanh.f32 %v1256_v10  ;;  %v2310_v61 = vmul.f32 -1.442695, %v1256_v10 }
 0xa45   :  { %v2478_v12 = vpop.eup %2477  ;;  %v1250_v14 = vpop.f32.mrf.mxu2 }
 0xa46   :  { %v1257_v40 = vadd.f32 %v1250_v14, %v287_v38  ;;  %1325 = vrot.lane.b32.xlu1 %v2478_v12, %s2580_s15 }
 0xa48   :  { %2479 = vtanh.f32 %v1257_v40  ;;  %v2311_v48 = vmul.f32 -1.442695, %v1257_v40 }
 0xa4d   :  { %v1253_v16 = vpop.f32.mrf.mxu2 }
 0xa4e   :  { %v2480_v42 = vpop.eup %2479  ;;  %v1258_v43 = vadd.f32 %v1253_v16, %v289_v41 }
 0xa4f   :  { %1327 = vrot.lane.b32.xlu2 %v2480_v42, %s2580_s15 }
 0xa50   :  { %2481 = vtanh.f32 %v1258_v43  ;;  %v2312_v11 = vmul.f32 -1.442695, %v1258_v43 }
 0xa51   :  { %2483 = vpow2.f32 %v2311_v48  ;;  %v3237_v48 = vsel %vm1176_vm6, %v3122_v52, %v3118_v44  ;;  %v3253_v44 = vsel %vm1175_vm3, %v3137_v24, %v3134_v49  ;;  %v3267_v49 = vsel %vm1177_vm4, %v3152_v50, %v3148_v47 }
 0xa56   :  { %v2482_v20 = vpop.eup %2481 }
 0xa57   :  { %1329 = vrot.lane.b32.xlu0 %v2482_v20, %s2580_s15  ;;  %v2484_v53 = vpop.eup %2483 }
 0xa58   :  { %v1269_v54 = vadd.f32 1.0, %v2484_v53 }
 0xa5a   :  { %2485 = vrcp.f32 %v1269_v54  ;;  %v1297_v1 = vand.u32 2147483648, %v1269_v54  ;;  %vm1291_vm8 = vweird.f32 %v1269_v54  ;;  %v1295_v22 = vand.u32 2147483647, %v1269_v54 }
 0xa5b   :  { %2487 = vpow2.f32 %v2310_v61 }
 0xa5c   :  { %v1298_v21 = vor.u32 1.1754944e-38, %v1297_v1  ;;  %vm1296_vm10 = vcmp.eq.f32.partialorder %v1295_v22, 8.507059e+37 }
 0xa60   :  { %v2486_v60 = vpop.eup %2485 }
 0xa61   :  { %v2488_v56 = vpop.eup %2487  ;;  %v1287_v51 = vmul.f32 %v2486_v60, %v1269_v54  ;;  %vm1292_vm7 = vweird.f32 %v2486_v60 }
 0xa62   :  { %v1268_v26 = vadd.f32 1.0, %v2488_v56  ;;  %vm1293_vm5 = vmor %vm1291_vm8, %vm1292_vm7  ;;  %v2315_v56 = vld [vmem:[%s3657_s2 + $0x70] sm:$0xff] }
 0xa63   :  { %v1288_v63 = vsub.f32 1.0, %v1287_v51 }
 0xa64   :  { %2489 = vrcp.f32 %v1268_v26  ;;  %v1282_v30 = vand.u32 2147483648, %v1268_v26  ;;  %vm1276_vm9 = vweird.f32 %v1268_v26  ;;  %v1280_v32 = vand.u32 2147483647, %v1268_v26 }
 0xa65   :  { %v1289_v59 = vmul.f32 %v2486_v60, %v1288_v63  ;;  %2491 = vpow2.f32 %v2312_v11  ;;  %v2314_v11 = vld [vmem:[%s3657_s2 + $0x68] sm:$0xff] }
 0xa66   :  { %v1283_v34 = vor.u32 1.1754944e-38, %v1282_v30  ;;  %vm1281_vm15 = vcmp.eq.f32.partialorder %v1280_v32, 8.507059e+37  ;;  %vm1375_vm6 = vcmp.ne.f32.partialorder %v2314_v11, 0.0 }
 0xa67   :  { %v1290_v6 = vadd.f32 %v2486_v60, %v1289_v59  ;;  %v1378_v24 = vsel %vm1375_vm6, 1, %v2581_v45 }
 0xa69   :  { %v1294_v39 = vsel %vm1293_vm5, %v2486_v60, %v1290_v6  ;;  %vm1376_vm5 = vcmp.ne.f32.partialorder %v2315_v56, 0.0 }
 0xa6a   :  { %v2490_v0 = vpop.eup %2489  ;;  %v3223_v23 = vsel %vm1296_vm10, %v1298_v21, %v1294_v39  ;;  %v1379_v46 = vsel %vm1376_vm5, 1, %v2581_v45 }
 0xa6b   :  { %v1272_v35 = vmul.f32 %v2490_v0, %v1268_v26  ;;  %v2492_v9 = vpop.eup %2491  ;;  %vm1277_vm12 = vweird.f32 %v2490_v0  ;;  %v1320_v53 = vmul.f32 %v3223_v23, %v3237_v48 }
 0xa6c   :  { %v1270_v27 = vadd.f32 1.0, %v2492_v9  ;;  %vm1278_vm14 = vmor %vm1276_vm9, %vm1277_vm12 }
 0xa6d   :  { %v1273_v62 = vsub.f32 1.0, %v1272_v35 }
 0xa6e   :  { %2493 = vrcp.f32 %v1270_v27  ;;  %v1312_v40 = vand.u32 2147483648, %v1270_v27  ;;  %vm1306_vm13 = vweird.f32 %v1270_v27  ;;  %v1310_v15 = vand.u32 2147483647, %v1270_v27 }
 0xa6f   :  { %v1274_v55 = vmul.f32 %v2490_v0, %v1273_v62 }
 0xa70   :  { %v1313_v16 = vor.u32 1.1754944e-38, %v1312_v40  ;;  %vm1311_vm8 = vcmp.eq.f32.partialorder %v1310_v15, 8.507059e+37 }
 0xa71   :  { %v1275_v29 = vadd.f32 %v2490_v0, %v1274_v55 }
 0xa73   :  { %v1279_v33 = vsel %vm1278_vm14, %v2490_v0, %v1275_v29 }
 0xa74   :  { %v2494_v31 = vpop.eup %2493  ;;  %v1284_v10 = vsel %vm1281_vm15, %v1283_v34, %v1279_v33  ;;  %v148_v34 = vpop.f32.mrf.mxu0 }
 0xa75   :  { %v1302_v5 = vmul.f32 %v2494_v31, %v1270_v27  ;;  %vm1307_vm2 = vweird.f32 %v2494_v31  ;;  %v1319_v52 = vmul.f32 %v1284_v10, %v3253_v44 }
 0xa76   :  { %vm1308_vm7 = vmor %vm1306_vm13, %vm1307_vm2 }
 0xa77   :  { %v1303_v38 = vsub.f32 1.0, %v1302_v5  ;;  %v149_v5 = vadd.f32 %v3210_v3, %v148_v34 }
 0xa79   :  { %v1304_v12 = vmul.f32 %v2494_v31, %v1303_v38 }
 0xa7b   :  { %v1305_v14 = vadd.f32 %v2494_v31, %v1304_v12 }
 0xa7d   :  { %v1309_v41 = vsel %vm1308_vm7, %v2494_v31, %v1305_v14 }
 0xa7e   :  { %v1314_v43 = vsel %vm1311_vm8, %v1313_v16, %v1309_v41 }
 0xa7f   :  { %v1321_v58 = vmul.f32 %v1314_v43, %v3267_v49 }
 0xaa9   :  { %v1328_v13 = vpop.permute.xlu2 %1327 }
 0xaaa   :  { %v1335_v28 = vmul.f32 %v1328_v13, %v3223_v23 }
 0xaac   :  { %1342 = vrot.lane.b32.xlu2 %v1335_v28, %s2580_s15 }
 0xab4   :  { %1381 = vperm.xlu2 %2376, %v1377_v25  }
 0xab8   :  { %v1326_v8 = vpop.permute.xlu1 %1325 }
 0xab9   :  { %v1334_v36 = vmul.f32 %v1326_v8, %v1284_v10 }
 0xabb   :  { %1340 = vrot.lane.b32.xlu1 %v1334_v36, %s2580_s15 }
 0xac9   :  { %v1330_v42 = vpop.permute.xlu0 %1329 }
 0xaca   :  { %v1336_v20 = vmul.f32 %v1330_v42, %v1314_v43 }
 0xacc   :  { %1344 = vrot.lane.b32.xlu0 %v1336_v20, %s2580_s15 }
 0xb06   :  { %v1343_v54 = vpop.permute.xlu2 %1342 }
 0xb07   :  { %v3241_v61 = vadd.f32 %v1343_v54, %v1320_v53 }
 0xb09   :  { %2495 = vtanh.f32 %v3241_v61 }
 0xb0e   :  { %v3275_v1 = vpop.permute.xlu2 %1381 }
 0xb0f   :  { %v2496_v60 = vpop.eup %2495  ;;  %vm1389_vm3 = vcmp.eq.s32.totalorder %v3275_v1, 1 }
 0xb10   :  { %1360 = vrot.lane.b32.xlu0 %v2496_v60, %s2580_s15 }
 0xb18   :  { %1387 = vperm.xlu0 %2375, %v1379_v46  }
 0xb2d   :  { %v1341_v51 = vpop.permute.xlu1 %1340 }
 0xb2e   :  { %v3256_v26 = vadd.f32 %v1341_v51, %v1319_v52 }
 0xb30   :  { %2497 = vtanh.f32 %v3256_v26 }
 0xb36   :  { %v2498_v63 = vpop.eup %2497 }
 0xb37   :  { %1358 = vrot.lane.b32.xlu1 %v2498_v63, %s2580_s15 }
 0xb3e   :  { %v1345_v59 = vpop.permute.xlu0 %1344 }
 0xb3f   :  { %v3271_v0 = vadd.f32 %v1345_v59, %v1321_v58  ;;  %1384 = vperm.xlu1 %2374, %v1378_v24  }
 0xb41   :  { %2499 = vtanh.f32 %v3271_v0 }
 0xb47   :  { %v2500_v6 = vpop.eup %2499 }
 0xb48   :  { %1362 = vrot.lane.b32.xlu2 %v2500_v6, %s2580_s15 }
 0xb82   :  { %v1361_v22 = vpop.permute.xlu0 %1360 }
 0xb83   :  { %v1368_v27 = vmul.f32 %v1361_v22, %v3223_v23 }
 0xb8a   :  { %v3286_v39 = vpop.permute.xlu0 %1387 }
 0xb8b   :  { %vm1391_vm4 = vcmp.eq.s32.totalorder %v3286_v39, 1 }
 0xba2   :  { %v1363_v47 = vpop.permute.xlu2 %1362 }
 0xba3   :  { %v1369_v21 = vmul.f32 %v1363_v47, %v1314_v43 }
 0xba9   :  { %v1359_v35 = vpop.permute.xlu1 %1358 }
 0xbaa   :  { %v1367_v57 = vmul.f32 %v1359_v35, %v1284_v10 }
 0xbac   :  { %v3281_v50 = vsel %vm1389_vm3, %v1367_v57, %v3162_v4  ;;  %v3296_v4 = vsel %vm1391_vm4, %v1369_v21, %v3177_v2  ;;  %v2361_v2 = vld [vmem:[%s3653_s1 + $0x28] sm:$0xff] }
 0xbad   :  { %1411 = vrot.lane.b32.xlu1 %v3281_v50, %s2582_s22  ;;  %v1405_v9 = vmul.f32 0.0, %v3281_v50  ;;  %v1404_v23 = vmul.f32 0.0, %v3296_v4  ;;  %2274 = vmatmul.msk.bf16.gmra.mxu1 %vm232_vm0, %v2361_v2 }
 0xbaf   :  { %1423 = vrot.lane.b32.xlu2 %v1405_v9, %s2583_s23 }
 0xbb1   :  { %v3291_v13 = vpop.permute.xlu1 %1384 }
 0xbb2   :  { %vm1390_vm10 = vcmp.eq.s32.totalorder %v3291_v13, 1 }
 0xbb3   :  { %v3302_v62 = vsel %vm1390_vm10, %v1368_v27, %v3183_v17 }
 0xbb4   :  { %v1403_v28 = vmul.f32 0.0, %v3302_v62 }
 0xbb5   :  { %1425 = vrot.lane.b32.xlu1 %v3302_v62, %s2583_s23 }
 0xbb6   :  { %1413 = vrot.lane.b32.xlu0 %v1403_v28, %s2582_s22 }
 0xbb7   :  { %1415 = vrot.lane.b32.xlu2 %v1404_v23, %s2582_s22 }
 0xbbe   :  { %1427 = vrot.lane.b32.xlu0 %v3296_v4, %s2583_s23 }
 0xc09   :  { %v1424_v17 = vpop.permute.xlu2 %1423 }
 0xc11   :  { %v1416_v31 = vpop.permute.xlu2 %1415 }
 0xc1f   :  { %v1412_v7 = vpop.permute.xlu1 %1411 }
 0xc20   :  { %v1432_v55 = vsel %vm232_vm0, %v1412_v7, %v1424_v17  ;;  %v2322_v7 = vld [vmem:[%s3657_s2 + $0x78] sm:$0xff] }
 0xc21   :  { %2316 = vmatmul.msk.f32.vlgmr.msra.gmra.mxu3 %vm114_vm1, %v1432_v55  ;;  %vm1588_vm15 = vcmp.ne.f32.partialorder %v2322_v7, 0.0 }
 0xc27   :  { %v1426_v25 = vpop.permute.xlu1 %1425 }
 0xc28   :  { %v1414_v29 = vpop.permute.xlu0 %1413 }
 0xc29   :  { %v1433_v30 = vsel %vm232_vm0, %v1414_v29, %v1426_v25  ;;  %v1591_v25 = vsel %vm1588_vm15, 1, %v2581_v45 }
 0xc2a   :  { %2317 = vmatmul.msk.f32.gmra.mxu3 %vm114_vm1, %v1433_v30  ;;  %v291_v36 = vpop.f32.mrf.mxu1 }
 0xc2b   :  { %v292_v38 = vadd.f32 %v3216_v37, %v291_v36 }
 0xc30   :  { %v1428_v32 = vpop.permute.xlu0 %1427 }
 0xc31   :  { %v1434_v33 = vsel %vm232_vm0, %v1416_v31, %v1428_v32 }
 0xc32   :  { %2318 = vmatmul.msk.f32.gmra.mxu3 %vm114_vm1, %v1434_v33  ;;  %v293_v15 = vpop.f32.mrf.mxu1 }
 0xc33   :  { %v294_v41 = vadd.f32 %v3216_v37, %v293_v15 }
 0xca4   :  { %v1461_v8 = vpop.f32.mrf.mxu3 }
 0xca5   :  { %v1470_v10 = vadd.f32 %v1461_v8, %v149_v5 }
 0xca7   :  { %2501 = vtanh.f32 %v1470_v10  ;;  %v2319_v56 = vmul.f32 -1.442695, %v1470_v10 }
 0xcad   :  { %v2502_v12 = vpop.eup %2501  ;;  %v1464_v14 = vpop.f32.mrf.mxu3 }
 0xcae   :  { %v1471_v40 = vadd.f32 %v1464_v14, %v292_v38  ;;  %1539 = vrot.lane.b32.xlu1 %v2502_v12, %s2580_s15 }
 0xcb0   :  { %2503 = vtanh.f32 %v1471_v40  ;;  %v2320_v53 = vmul.f32 -1.442695, %v1471_v40 }
 0xcb5   :  { %v1467_v16 = vpop.f32.mrf.mxu3 }
 0xcb6   :  { %v2504_v42 = vpop.eup %2503  ;;  %v1472_v43 = vadd.f32 %v1467_v16, %v294_v41 }
 0xcb7   :  { %1541 = vrot.lane.b32.xlu2 %v2504_v42, %s2580_s15 }
 0xcb8   :  { %2505 = vtanh.f32 %v1472_v43  ;;  %v2321_v24 = vmul.f32 -1.442695, %v1472_v43 }
 0xcb9   :  { %2507 = vpow2.f32 %v2320_v53  ;;  %v3342_v53 = vsel %vm1390_vm10, %v3241_v61, %v3237_v48  ;;  %v3358_v48 = vsel %vm1389_vm3, %v3256_v26, %v3253_v44  ;;  %v3372_v44 = vsel %vm1391_vm4, %v3271_v0, %v3267_v49 }
 0xcbe   :  { %v2506_v20 = vpop.eup %2505 }
 0xcbf   :  { %1543 = vrot.lane.b32.xlu0 %v2506_v20, %s2580_s15  ;;  %v2508_v54 = vpop.eup %2507 }
 0xcc0   :  { %v1483_v60 = vadd.f32 1.0, %v2508_v54 }
 0xcc2   :  { %2509 = vrcp.f32 %v1483_v60  ;;  %v1511_v22 = vand.u32 2147483648, %v1483_v60  ;;  %vm1505_vm12 = vweird.f32 %v1483_v60  ;;  %v1509_v35 = vand.u32 2147483647, %v1483_v60 }
 0xcc3   :  { %2511 = vpow2.f32 %v2319_v56 }
 0xcc4   :  { %v1512_v21 = vor.u32 1.1754944e-38, %v1511_v22  ;;  %vm1510_vm14 = vcmp.eq.f32.partialorder %v1509_v35, 8.507059e+37  ;;  %v2351_v22 = vld [vmem:[%s3655_s0 + $0x18] sm:$0xff] }
 0xcc5   :  { %2228 = vmatmul.msk.bf16.gmra.mxu0 %vm114_vm1, %v2351_v22 }
 0xcc8   :  { %v2510_v46 = vpop.eup %2509 }
 0xcc9   :  { %v2512_v52 = vpop.eup %2511  ;;  %v1501_v51 = vmul.f32 %v2510_v46, %v1483_v60  ;;  %vm1506_vm11 = vweird.f32 %v2510_v46 }
 0xcca   :  { %v1482_v63 = vadd.f32 1.0, %v2512_v52  ;;  %vm1507_vm9 = vmor %vm1505_vm12, %vm1506_vm11  ;;  %v2324_v52 = vld [vmem:[%s3657_s2 + $0x88] sm:$0xff] }
 0xccb   :  { %v1502_v11 = vsub.f32 1.0, %v1501_v51 }
 0xccc   :  { %2513 = vrcp.f32 %v1482_v63  ;;  %v1496_v30 = vand.u32 2147483648, %v1482_v63  ;;  %vm1490_vm13 = vweird.f32 %v1482_v63  ;;  %v1494_v32 = vand.u32 2147483647, %v1482_v63 }
 0xccd   :  { %v1503_v58 = vmul.f32 %v2510_v46, %v1502_v11  ;;  %2515 = vpow2.f32 %v2321_v24  ;;  %v2323_v24 = vld [vmem:[%s3657_s2 + $0x80] sm:$0xff] }
 0xcce   :  { %v1497_v34 = vor.u32 1.1754944e-38, %v1496_v30  ;;  %vm1495_vm8 = vcmp.eq.f32.partialorder %v1494_v32, 8.507059e+37  ;;  %vm1589_vm10 = vcmp.ne.f32.partialorder %v2323_v24, 0.0 }
 0xccf   :  { %v1504_v6 = vadd.f32 %v2510_v46, %v1503_v58  ;;  %v1592_v26 = vsel %vm1589_vm10, 1, %v2581_v45 }
 0xcd1   :  { %v1508_v9 = vsel %vm1507_vm9, %v2510_v46, %v1504_v6  ;;  %vm1590_vm9 = vcmp.ne.f32.partialorder %v2324_v52, 0.0 }
 0xcd2   :  { %v2514_v59 = vpop.eup %2513  ;;  %v3328_v28 = vsel %vm1510_vm14, %v1512_v21, %v1508_v9  ;;  %v1593_v13 = vsel %vm1590_vm9, 1, %v2581_v45 }
 0xcd3   :  { %v1486_v57 = vmul.f32 %v2514_v59, %v1482_v63  ;;  %v2516_v47 = vpop.eup %2515  ;;  %vm1491_vm2 = vweird.f32 %v2514_v59  ;;  %v1534_v54 = vmul.f32 %v3328_v28, %v3342_v53 }
 0xcd4   :  { %v1484_v27 = vadd.f32 1.0, %v2516_v47  ;;  %vm1492_vm7 = vmor %vm1490_vm13, %vm1491_vm2 }
 0xcd5   :  { %v1487_v2 = vsub.f32 1.0, %v1486_v57 }
 0xcd6   :  { %2517 = vrcp.f32 %v1484_v27  ;;  %v1526_v40 = vand.u32 2147483648, %v1484_v27  ;;  %vm1520_vm6 = vweird.f32 %v1484_v27  ;;  %v1524_v15 = vand.u32 2147483647, %v1484_v27 }
 0xcd7   :  { %v1488_v55 = vmul.f32 %v2514_v59, %v1487_v2 }
 0xcd8   :  { %v1527_v16 = vor.u32 1.1754944e-38, %v1526_v40  ;;  %vm1525_vm12 = vcmp.eq.f32.partialorder %v1524_v15, 8.507059e+37 }
 0xcd9   :  { %v1489_v29 = vadd.f32 %v2514_v59, %v1488_v55 }
 0xcdb   :  { %v1493_v33 = vsel %vm1492_vm7, %v2514_v59, %v1489_v29 }
 0xcdc   :  { %v2518_v31 = vpop.eup %2517  ;;  %v1498_v10 = vsel %vm1495_vm8, %v1497_v34, %v1493_v33 }
 0xcdd   :  { %v1516_v5 = vmul.f32 %v2518_v31, %v1484_v27  ;;  %vm1521_vm5 = vweird.f32 %v2518_v31  ;;  %v1533_v61 = vmul.f32 %v1498_v10, %v3358_v48 }
 0xcde   :  { %vm1522_vm11 = vmor %vm1520_vm6, %vm1521_vm5 }
 0xcdf   :  { %v1517_v38 = vsub.f32 1.0, %v1516_v5 }
 0xce1   :  { %v1518_v12 = vmul.f32 %v2518_v31, %v1517_v38 }
 0xce3   :  { %v1519_v14 = vadd.f32 %v2518_v31, %v1518_v12 }
 0xce5   :  { %v1523_v41 = vsel %vm1522_vm11, %v2518_v31, %v1519_v14 }
 0xce6   :  { %v1528_v43 = vsel %vm1525_vm12, %v1527_v16, %v1523_v41 }
 0xce7   :  { %v1535_v1 = vmul.f32 %v1528_v43, %v3372_v44 }
 0xd11   :  { %v1542_v23 = vpop.permute.xlu2 %1541 }
 0xd12   :  { %v1549_v17 = vmul.f32 %v1542_v23, %v3328_v28 }
 0xd14   :  { %1556 = vrot.lane.b32.xlu2 %v1549_v17, %s2580_s15 }
 0xd1c   :  { %1595 = vperm.xlu2 %2376, %v1591_v25  }
 0xd20   :  { %v1540_v8 = vpop.permute.xlu1 %1539 }
 0xd21   :  { %v1548_v36 = vmul.f32 %v1540_v8, %v1498_v10 }
 0xd23   :  { %1554 = vrot.lane.b32.xlu1 %v1548_v36, %s2580_s15 }
 0xd31   :  { %v1544_v42 = vpop.permute.xlu0 %1543 }
 0xd32   :  { %v1550_v20 = vmul.f32 %v1544_v42, %v1528_v43 }
 0xd34   :  { %1558 = vrot.lane.b32.xlu0 %v1550_v20, %s2580_s15 }
 0xd42   :  { %v151_v5 = vpop.f32.mrf.mxu0 }
 0xd4a   :  { %v3431_v8 = vpop.f32.mrf.mxu0 }
 0xd6e   :  { %v1557_v60 = vpop.permute.xlu2 %1556 }
 0xd6f   :  { %v3346_v56 = vadd.f32 %v1557_v60, %v1534_v54 }
 0xd71   :  { %2519 = vtanh.f32 %v3346_v56 }
 0xd76   :  { %v3384_v49 = vpop.permute.xlu2 %1595 }
 0xd77   :  { %v2520_v46 = vpop.eup %2519  ;;  %vm1603_vm3 = vcmp.eq.s32.totalorder %v3384_v49, 1 }
 0xd78   :  { %1574 = vrot.lane.b32.xlu0 %v2520_v46, %s2580_s15 }
 0xd80   :  { %1601 = vperm.xlu0 %2375, %v1593_v13  }
 0xd95   :  { %v1555_v51 = vpop.permute.xlu1 %1554 }
 0xd96   :  { %v3361_v63 = vadd.f32 %v1555_v51, %v1533_v61 }
 0xd98   :  { %2521 = vtanh.f32 %v3361_v63 }
 0xd9e   :  { %v2522_v11 = vpop.eup %2521 }
 0xd9f   :  { %1572 = vrot.lane.b32.xlu1 %v2522_v11, %s2580_s15 }
 0xda6   :  { %v1559_v58 = vpop.permute.xlu0 %1558 }
 0xda7   :  { %v3376_v59 = vadd.f32 %v1559_v58, %v1535_v1  ;;  %1598 = vperm.xlu1 %2374, %v1592_v26  }
 0xda9   :  { %2523 = vtanh.f32 %v3376_v59 }
 0xdaf   :  { %v2524_v6 = vpop.eup %2523 }
 0xdb0   :  { %1576 = vrot.lane.b32.xlu2 %v2524_v6, %s2580_s15 }
 0xdea   :  { %v1575_v0 = vpop.permute.xlu0 %1574 }
 0xdeb   :  { %v1582_v23 = vmul.f32 %v1575_v0, %v3328_v28 }
 0xdf2   :  { %v3395_v21 = vpop.permute.xlu0 %1601 }
 0xdf3   :  { %vm1605_vm4 = vcmp.eq.s32.totalorder %v3395_v21, 1 }
 0xe0a   :  { %v1577_v57 = vpop.permute.xlu2 %1576 }
 0xe0b   :  { %v1583_v27 = vmul.f32 %v1577_v57, %v1528_v43 }
 0xe11   :  { %v1573_v39 = vpop.permute.xlu1 %1572 }
 0xe12   :  { %v1581_v35 = vmul.f32 %v1573_v39, %v1498_v10  ;;  %v152_v10 = vadd.f32 %v3210_v3, %v151_v5 }
 0xe14   :  { %v3390_v47 = vsel %vm1603_vm3, %v1581_v35, %v3281_v50  ;;  %v3405_v50 = vsel %vm1605_vm4, %v1583_v27, %v3296_v4  ;;  %v2362_v4 = vld [vmem:[%s3653_s1 + $0x30] sm:$0xff] }
 0xe15   :  { %1625 = vrot.lane.b32.xlu1 %v3390_v47, %s2582_s22  ;;  %v1619_v9 = vmul.f32 0.0, %v3390_v47  ;;  %v1618_v28 = vmul.f32 0.0, %v3405_v50  ;;  %2275 = vmatmul.msk.bf16.gmra.mxu1 %vm232_vm0, %v2362_v4 }
 0xe17   :  { %1637 = vrot.lane.b32.xlu2 %v1619_v9, %s2583_s23 }
 0xe19   :  { %v3400_v2 = vpop.permute.xlu1 %1598 }
 0xe1a   :  { %vm1604_vm14 = vcmp.eq.s32.totalorder %v3400_v2, 1 }
 0xe1b   :  { %v3411_v17 = vsel %vm1604_vm14, %v1582_v23, %v3302_v62 }
 0xe1c   :  { %v1617_v7 = vmul.f32 0.0, %v3411_v17 }
 0xe1d   :  { %1639 = vrot.lane.b32.xlu1 %v3411_v17, %s2583_s23 }
 0xe1e   :  { %1627 = vrot.lane.b32.xlu0 %v1617_v7, %s2582_s22 }
 0xe1f   :  { %1629 = vrot.lane.b32.xlu2 %v1618_v28, %s2582_s22 }
 0xe26   :  { %1641 = vrot.lane.b32.xlu0 %v3405_v50, %s2583_s23 }
 0xe71   :  { %v1638_v62 = vpop.permute.xlu2 %1637 }
 0xe79   :  { %v1630_v32 = vpop.permute.xlu2 %1629 }
 0xe87   :  { %v1626_v55 = vpop.permute.xlu1 %1625 }
 0xe88   :  { %v1646_v25 = vsel %vm232_vm0, %v1626_v55, %v1638_v62 }
 0xe89   :  { %2325 = vmatmul.msk.f32.vlgmr.msrb.gmra.mxu0 %vm114_vm1, %v1646_v25  ;;  %v2331_v25 = vld [vmem:[%s3657_s2 + $0x90] sm:$0xff] }
 0xe8a   :  { %vm1802_vm8 = vcmp.ne.f32.partialorder %v2331_v25, 0.0 }
 0xe8f   :  { %v1640_v29 = vpop.permute.xlu1 %1639 }
 0xe90   :  { %v1628_v30 = vpop.permute.xlu0 %1627 }
 0xe91   :  { %v1647_v31 = vsel %vm232_vm0, %v1628_v30, %v1640_v29  ;;  %v1805_v30 = vsel %vm1802_vm8, 1, %v2581_v45 }
 0xe92   :  { %2326 = vmatmul.msk.f32.gmra.mxu0 %vm114_vm1, %v1647_v31  ;;  %v296_v12 = vpop.f32.mrf.mxu1 }
 0xe93   :  { %v297_v14 = vadd.f32 %v3216_v37, %v296_v12 }
 0xe98   :  { %v1642_v33 = vpop.permute.xlu0 %1641 }
 0xe99   :  { %v1648_v34 = vsel %vm232_vm0, %v1630_v32, %v1642_v33 }
 0xe9a   :  { %2327 = vmatmul.msk.f32.gmra.mxu0 %vm114_vm1, %v1648_v34  ;;  %v298_v16 = vpop.f32.mrf.mxu1 }
 0xe9b   :  { %v299_v42 = vadd.f32 %v3216_v37, %v298_v16 }
 0xf06   :  { %v1675_v36 = vpop.f32.mrf.mxu0 }
 0xf07   :  { %v1684_v38 = vadd.f32 %v1675_v36, %v152_v10 }
 0xf09   :  { %2525 = vtanh.f32 %v1684_v38  ;;  %v2328_v61 = vmul.f32 -1.442695, %v1684_v38 }
 0xf0f   :  { %v2526_v40 = vpop.eup %2525  ;;  %v1678_v15 = vpop.f32.mrf.mxu0 }
 0xf10   :  { %v1685_v41 = vadd.f32 %v1678_v15, %v297_v14  ;;  %1753 = vrot.lane.b32.xlu1 %v2526_v40, %s2580_s15 }
 0xf12   :  { %2527 = vtanh.f32 %v1685_v41  ;;  %v2329_v46 = vmul.f32 -1.442695, %v1685_v41 }
 0xf17   :  { %v1681_v43 = vpop.f32.mrf.mxu0 }
 0xf18   :  { %v2528_v20 = vpop.eup %2527  ;;  %v1686_v54 = vadd.f32 %v1681_v43, %v299_v42 }
 0xf19   :  { %1755 = vrot.lane.b32.xlu2 %v2528_v20, %s2580_s15 }
 0xf1a   :  { %2529 = vtanh.f32 %v1686_v54  ;;  %v2330_v58 = vmul.f32 -1.442695, %v1686_v54 }
 0xf1b   :  { %2531 = vpow2.f32 %v2329_v46 }
 0xf20   :  { %v2530_v60 = vpop.eup %2529 }
 0xf21   :  { %1757 = vrot.lane.b32.xlu0 %v2530_v60, %s2580_s15  ;;  %v2532_v52 = vpop.eup %2531 }
 0xf22   :  { %v1697_v13 = vadd.f32 1.0, %v2532_v52  ;;  %v3453_v52 = vsel %vm1604_vm14, %v3346_v56, %v3342_v53  ;;  %v3469_v53 = vsel %vm1603_vm3, %v3361_v63, %v3358_v48  ;;  %v3483_v48 = vsel %vm1605_vm4, %v3376_v59, %v3372_v44 }
 0xf24   :  { %2533 = vrcp.f32 %v1697_v13  ;;  %v1725_v39 = vand.u32 2147483648, %v1697_v13  ;;  %vm1719_vm2 = vweird.f32 %v1697_v13  ;;  %v1723_v35 = vand.u32 2147483647, %v1697_v13 }
 0xf25   :  { %2535 = vpow2.f32 %v2328_v61 }
 0xf26   :  { %v1726_v23 = vor.u32 1.1754944e-38, %v1725_v39  ;;  %vm1724_vm7 = vcmp.eq.f32.partialorder %v1723_v35, 8.507059e+37 }
 0xf2a   :  { %v2534_v51 = vpop.eup %2533 }
 0xf2b   :  { %v2536_v11 = vpop.eup %2535  ;;  %v1715_v24 = vmul.f32 %v2534_v51, %v1697_v13  ;;  %vm1720_vm15 = vweird.f32 %v2534_v51 }
 0xf2c   :  { %v1696_v26 = vadd.f32 1.0, %v2536_v11  ;;  %vm1721_vm13 = vmor %vm1719_vm2, %vm1720_vm15 }
 0xf2d   :  { %v1716_v1 = vsub.f32 1.0, %v1715_v24  ;;  %v2333_v24 = vld [vmem:[%s3657_s2 + $0xa0] sm:$0xff] }
 0xf2e   :  { %2537 = vrcp.f32 %v1696_v26  ;;  %v1710_v32 = vand.u32 2147483648, %v1696_v26  ;;  %vm1704_vm6 = vweird.f32 %v1696_v26  ;;  %v1708_v34 = vand.u32 2147483647, %v1696_v26 }
 0xf2f   :  { %v1717_v6 = vmul.f32 %v2534_v51, %v1716_v1  ;;  %2539 = vpow2.f32 %v2330_v58 }
 0xf30   :  { %v1711_v10 = vor.u32 1.1754944e-38, %v1710_v32  ;;  %vm1709_vm12 = vcmp.eq.f32.partialorder %v1708_v34, 8.507059e+37 }
 0xf31   :  { %v1718_v0 = vadd.f32 %v2534_v51, %v1717_v6  ;;  %v2332_v6 = vld [vmem:[%s3657_s2 + $0x98] sm:$0xff] }
 0xf32   :  { %vm1803_vm14 = vcmp.ne.f32.partialorder %v2332_v6, 0.0 }
 0xf33   :  { %v1722_v27 = vsel %vm1721_vm13, %v2534_v51, %v1718_v0  ;;  %vm1804_vm13 = vcmp.ne.f32.partialorder %v2333_v24, 0.0  ;;  %v1806_v63 = vsel %vm1803_vm14, 1, %v2581_v45 }
 0xf34   :  { %v2538_v22 = vpop.eup %2537  ;;  %v3439_v28 = vsel %vm1724_vm7, %v1726_v23, %v1722_v27  ;;  %v1807_v2 = vsel %vm1804_vm13, 1, %v2581_v45 }
 0xf35   :  { %v1700_v57 = vmul.f32 %v2538_v22, %v1696_v26  ;;  %v2540_v9 = vpop.eup %2539  ;;  %vm1705_vm5 = vweird.f32 %v2538_v22  ;;  %v1748_v13 = vmul.f32 %v3439_v28, %v3453_v52 }
 0xf36   :  { %v1698_v7 = vadd.f32 1.0, %v2540_v9  ;;  %vm1706_vm11 = vmor %vm1704_vm6, %vm1705_vm5 }
 0xf37   :  { %v1701_v62 = vsub.f32 1.0, %v1700_v57 }
 0xf38   :  { %2541 = vrcp.f32 %v1698_v7  ;;  %v1740_v16 = vand.u32 2147483648, %v1698_v7  ;;  %vm1734_vm10 = vweird.f32 %v1698_v7  ;;  %v1738_v42 = vand.u32 2147483647, %v1698_v7 }
 0xf39   :  { %v1702_v29 = vmul.f32 %v2538_v22, %v1701_v62 }
 0xf3a   :  { %v1741_v20 = vor.u32 1.1754944e-38, %v1740_v16  ;;  %vm1739_vm2 = vcmp.eq.f32.partialorder %v1738_v42, 8.507059e+37 }
 0xf3b   :  { %v1703_v31 = vadd.f32 %v2538_v22, %v1702_v29 }
 0xf3d   :  { %v1707_v5 = vsel %vm1706_vm11, %v2538_v22, %v1703_v31 }
 0xf3e   :  { %v2542_v33 = vpop.eup %2541  ;;  %v1712_v12 = vsel %vm1709_vm12, %v1711_v10, %v1707_v5  ;;  %v154_v10 = vadd.f32 %v3210_v3, %v3431_v8 }
 0xf3f   :  { %v1730_v36 = vmul.f32 %v2542_v33, %v1698_v7  ;;  %vm1735_vm9 = vweird.f32 %v2542_v33  ;;  %v1747_v56 = vmul.f32 %v1712_v12, %v3469_v53 }
 0xf40   :  { %vm1736_vm15 = vmor %vm1734_vm10, %vm1735_vm9 }
 0xf41   :  { %v1731_v40 = vsub.f32 1.0, %v1730_v36 }
 0xf43   :  { %v1732_v15 = vmul.f32 %v2542_v33, %v1731_v40 }
 0xf45   :  { %v1733_v41 = vadd.f32 %v2542_v33, %v1732_v15 }
 0xf47   :  { %v1737_v43 = vsel %vm1736_vm15, %v2542_v33, %v1733_v41  ;;  %v304_v41 = vadd.f32 %v3216_v37, %v2780_v19 }
 0xf48   :  { %v1742_v60 = vsel %vm1739_vm2, %v1741_v20, %v1737_v43 }
 0xf49   :  { %v1749_v49 = vmul.f32 %v1742_v60, %v3483_v48 }
 0xf73   :  { %v1756_v4 = vpop.permute.xlu2 %1755 }
 0xf74   :  { %v1763_v55 = vmul.f32 %v1756_v4, %v3439_v28 }
 0xf76   :  { %1770 = vrot.lane.b32.xlu2 %v1763_v55, %s2580_s15 }
 0xf7e   :  { %1809 = vperm.xlu2 %2376, %v1805_v30  }
 0xf82   :  { %v1754_v38 = vpop.permute.xlu1 %1753 }
 0xf83   :  { %v1762_v14 = vmul.f32 %v1754_v38, %v1712_v12 }
 0xf85   :  { %1768 = vrot.lane.b32.xlu1 %v1762_v14, %s2580_s15 }
 0xf93   :  { %v1758_v54 = vpop.permute.xlu0 %1757 }
 0xf94   :  { %v1764_v46 = vmul.f32 %v1758_v54, %v1742_v60 }
 0xf96   :  { %1772 = vrot.lane.b32.xlu0 %v1764_v46, %s2580_s15 }
 0xfd0   :  { %v1771_v61 = vpop.permute.xlu2 %1770 }
 0xfd1   :  { %v3457_v51 = vadd.f32 %v1771_v61, %v1748_v13 }
 0xfd3   :  { %2543 = vtanh.f32 %v3457_v51 }
 0xfd8   :  { %v3491_v35 = vpop.permute.xlu2 %1809 }
 0xfd9   :  { %v2544_v11 = vpop.eup %2543  ;;  %vm1817_vm3 = vcmp.eq.s32.totalorder %v3491_v35, 1 }
 0xfda   :  { %1788 = vrot.lane.b32.xlu0 %v2544_v11, %s2580_s15 }
 0xfe2   :  { %1815 = vperm.xlu0 %2375, %v1807_v2  }
 0xff7   :  { %v1769_v26 = vpop.permute.xlu1 %1768 }
 0xff8   :  { %v3472_v1 = vadd.f32 %v1769_v26, %v1747_v56 }
 0xffa   :  { %2545 = vtanh.f32 %v3472_v1 }
0x1000   :  { %v2546_v58 = vpop.eup %2545 }
0x1001   :  { %1786 = vrot.lane.b32.xlu1 %v2546_v58, %s2580_s15 }
0x1008   :  { %v1773_v22 = vpop.permute.xlu0 %1772 }
0x1009   :  { %v3487_v0 = vadd.f32 %v1773_v22, %v1749_v49  ;;  %1812 = vperm.xlu1 %2374, %v1806_v63   ;;  %v2341_v22 = vld [vmem:[%s3657_s2 + $0xb0] sm:$0xff] }
0x100a   :  { %vm2017_vm11 = vcmp.ne.f32.partialorder %v2341_v22, 0.0 }
0x100b   :  { %2547 = vtanh.f32 %v3487_v0 }
0x1011   :  { %v2548_v39 = vpop.eup %2547 }
0x1012   :  { %1790 = vrot.lane.b32.xlu2 %v2548_v39, %s2580_s15 }
0x104c   :  { %v1789_v57 = vpop.permute.xlu0 %1788 }
0x104d   :  { %v1796_v4 = vmul.f32 %v1789_v57, %v3439_v28  ;;  %v2020_v57 = vsel %vm2017_vm11, 1, %v2581_v45 }
0x1054   :  { %v3502_v23 = vpop.permute.xlu0 %1815 }
0x1055   :  { %vm1819_vm4 = vcmp.eq.s32.totalorder %v3502_v23, 1 }
0x106c   :  { %v1791_v44 = vpop.permute.xlu2 %1790 }
0x106d   :  { %v1797_v7 = vmul.f32 %v1791_v44, %v1742_v60 }
0x1073   :  { %v1787_v9 = vpop.permute.xlu1 %1786 }
0x1074   :  { %v1795_v21 = vmul.f32 %v1787_v9, %v1712_v12  ;;  %v302_v12 = vadd.f32 %v3216_v37, %v2778_v18 }
0x1076   :  { %v3497_v59 = vsel %vm1817_vm3, %v1795_v21, %v3390_v47  ;;  %v3512_v47 = vsel %vm1819_vm4, %v1797_v7, %v3405_v50 }
0x1077   :  { %1839 = vrot.lane.b32.xlu1 %v3497_v59, %s2582_s22  ;;  %v1833_v27 = vmul.f32 0.0, %v3497_v59  ;;  %v1832_v28 = vmul.f32 0.0, %v3512_v47 }
0x1079   :  { %1851 = vrot.lane.b32.xlu2 %v1833_v27, %s2583_s23 }
0x107b   :  { %v3507_v62 = vpop.permute.xlu1 %1812 }
0x107c   :  { %vm1818_vm7 = vcmp.eq.s32.totalorder %v3507_v62, 1  ;;  %v2098_v62 = vld [vmem:[%s3659_s10 + $0x18] sm:$0xff] }
0x107d   :  { %v3518_v55 = vsel %vm1818_vm7, %v1796_v4, %v3411_v17  ;;  %2116 = vmatpush.msra.mxu0 %v2098_v62 }
0x107e   :  { %v1831_v25 = vmul.f32 0.0, %v3518_v55 }
0x107f   :  { %1853 = vrot.lane.b32.xlu1 %v3518_v55, %s2583_s23 }
0x1080   :  { %1841 = vrot.lane.b32.xlu0 %v1831_v25, %s2582_s22 }
0x1081   :  { %1843 = vrot.lane.b32.xlu2 %v1832_v28, %s2582_s22 }
0x1088   :  { %1855 = vrot.lane.b32.xlu0 %v3512_v47, %s2583_s23 }
0x10d3   :  { %v1852_v50 = vpop.permute.xlu2 %1851 }
0x10db   :  { %v1844_v33 = vpop.permute.xlu2 %1843 }
0x10e9   :  { %v1840_v29 = vpop.permute.xlu1 %1839 }
0x10ea   :  { %v1860_v30 = vsel %vm232_vm0, %v1840_v29, %v1852_v50 }
0x10eb   :  { %2334 = vmatmul.msk.f32.vlgmr.msra.gmra.mxu2 %vm114_vm1, %v1860_v30 }
0x10f1   :  { %v1854_v17 = vpop.permute.xlu1 %1853 }
0x10f2   :  { %v1842_v31 = vpop.permute.xlu0 %1841 }
0x10f3   :  { %v1861_v32 = vsel %vm232_vm0, %v1842_v31, %v1854_v17 }
0x10f4   :  { %2335 = vmatmul.msk.f32.gmra.mxu2 %vm114_vm1, %v1861_v32 }
0x10fa   :  { %v1856_v34 = vpop.permute.xlu0 %1855 }
0x10fb   :  { %v1862_v5 = vsel %vm232_vm0, %v1844_v33, %v1856_v34 }
0x10fc   :  { %2336 = vmatmul.msk.f32.gmra.mxu2 %vm114_vm1, %v1862_v5 }
0x116e   :  { %v1889_v36 = vpop.f32.mrf.mxu2 }
0x116f   :  { %v1898_v38 = vadd.f32 %v1889_v36, %v154_v10 }
0x1171   :  { %2549 = vtanh.f32 %v1898_v38  ;;  %v2337_v8 = vmul.f32 -1.442695, %v1898_v38 }
0x1177   :  { %v2550_v14 = vpop.eup %2549  ;;  %v1892_v40 = vpop.f32.mrf.mxu2 }
0x1178   :  { %v1899_v15 = vadd.f32 %v1892_v40, %v302_v12  ;;  %1967 = vrot.lane.b32.xlu2 %v2550_v14, %s2580_s15 }
0x117a   :  { %2551 = vtanh.f32 %v1899_v15  ;;  %v2338_v13 = vmul.f32 -1.442695, %v1899_v15 }
0x117f   :  { %v1895_v16 = vpop.f32.mrf.mxu2 }
0x1180   :  { %v2552_v42 = vpop.eup %2551  ;;  %v1900_v43 = vadd.f32 %v1895_v16, %v304_v41  ;;  %v1823_v16 = vsel %vm1817_vm3, %v3472_v1, %v3469_v53  ;;  %v1824_v53 = vsel %vm1818_vm7, %v3457_v51, %v3453_v52 }
0x1181   :  { %1969 = vrot.lane.b32.xlu1 %v2552_v42, %s2580_s15 }
0x1182   :  { %2553 = vtanh.f32 %v1900_v43  ;;  %v2339_v24 = vmul.f32 -1.442695, %v1900_v43 }
0x1183   :  { %2555 = vpow2.f32 %v2337_v8 }
0x1188   :  { %v2554_v3 = vpop.eup %2553 }
0x1189   :  { %1971 = vrot.lane.b32.xlu0 %v2554_v3, %s2580_s15  ;;  %v2556_v18 = vpop.eup %2555 }
0x118a   :  { %v1910_v20 = vadd.f32 1.0, %v2556_v18  ;;  %v2342_v18 = vld [vmem:[%s3657_s2 + $0xb8] sm:$0xff] }
0x118c   :  { %2557 = vrcp.f32 %v1910_v20  ;;  %v1924_v37 = vand.u32 2147483648, %v1910_v20  ;;  %vm1918_vm8 = vweird.f32 %v1910_v20  ;;  %v1922_v11 = vand.u32 2147483647, %v1910_v20 }
0x118d   :  { %2559 = vpow2.f32 %v2338_v13 }
0x118e   :  { %v1925_v26 = vor.u32 1.1754944e-38, %v1924_v37  ;;  %vm1923_vm6 = vcmp.eq.f32.partialorder %v1922_v11, 8.507059e+37  ;;  %2561 = vpow2.f32 %v2339_v24  ;;  %v2340_v37 = vld [vmem:[%s3657_s2 + $0xa8] sm:$0xff]  ;;  %v2097_v11 = vld [vmem:[%s3659_s10 + $0x10] sm:$0xff] }
0x118f   :  { %vm2016_vm3 = vcmp.ne.f32.partialorder %v2340_v37, 0.0  ;;  %v2096_v24 = vld [vmem:[%s3659_s10 + $0x8] sm:$0xff]  ;;  %2117 = vmatpush.msra.mxu0 %v2097_v11 }
0x1190   :  { %v2019_v52 = vsel %vm2016_vm3, 1, %v2581_v45 }
0x1191   :  { %2118 = vmatpush.msra.mxu0 %v2096_v24 }
0x1192   :  { %v2558_v54 = vpop.eup %2557 }
0x1193   :  { %v1914_v60 = vmul.f32 %v2558_v54, %v1910_v20  ;;  %vm1919_vm1 = vweird.f32 %v2558_v54  ;;  %v2560_v56 = vpop.eup %2559 }
0x1194   :  { %vm1920_vm5 = vmor %vm1918_vm8, %vm1919_vm1  ;;  %v1911_v63 = vadd.f32 1.0, %v2560_v56  ;;  %v2562_v39 = vpop.eup %2561  ;;  %vm2018_vm8 = vcmp.ne.f32.partialorder %v2342_v18, 0.0 }
0x1195   :  { %v1915_v46 = vsub.f32 1.0, %v1914_v60  ;;  %v1912_v9 = vadd.f32 1.0, %v2562_v39  ;;  %v2021_v20 = vsel %vm2018_vm8, 1, %v2581_v45  ;;  %v1825_v60 = vsel %vm1819_vm4, %v3487_v0, %v3483_v48  ;;  %v2044_v0 = vld [vmem:[%s3658_s9 + $0x18] sm:$0xff]  ;;  %v2043_v45 = vld [vmem:[%s3658_s9 + $0x10] sm:$0xff] }
0x1196   :  { %2563 = vrcp.f32 %v1911_v63  ;;  %v1939_v29 = vand.u32 2147483648, %v1911_v63  ;;  %vm1933_vm9 = vweird.f32 %v1911_v63  ;;  %v1937_v30 = vand.u32 2147483647, %v1911_v63  ;;  %2062 = vmatpush.msrb.mxu3 %v2044_v0 }
0x1197   :  { %v1916_v61 = vmul.f32 %v2558_v54, %v1915_v46  ;;  %2565 = vrcp.f32 %v1912_v9  ;;  %v1954_v36 = vand.u32 2147483648, %v1912_v9  ;;  %vm1948_vm13 = vweird.f32 %v1912_v9 }
0x1198   :  { %v1940_v32 = vor.u32 1.1754944e-38, %v1939_v29  ;;  %vm1938_vm15 = vcmp.eq.f32.partialorder %v1937_v30, 8.507059e+37  ;;  %v1952_v38 = vand.u32 2147483647, %v1912_v9  ;;  %2063 = vmatpush.msrb.mxu3 %v2043_v45  ;;  %v2132_v29 = vld [vmem:[%s3662_s12 + $0x8] sm:$0xff]  ;;  %v2131_v30 = vld [vmem:[%s3662_s12] sm:$0xff] }
0x1199   :  { %v1917_v19 = vadd.f32 %v2558_v54, %v1916_v61  ;;  %v1955_v14 = vor.u32 1.1754944e-38, %v1954_v36 }
0x119a   :  { %vm1953_vm1 = vcmp.eq.f32.partialorder %v1952_v38, 8.507059e+37 }
0x119b   :  { %v1921_v2 = vsel %vm1920_vm5, %v2558_v54, %v1917_v19 }
0x119c   :  { %v3543_v58 = vsel %vm1923_vm6, %v1925_v26, %v1921_v2  ;;  %v2564_v21 = vpop.eup %2563 }
0x119d   :  { %v1929_v44 = vmul.f32 %v2564_v21, %v1911_v63  ;;  %v2566_v7 = vpop.eup %2565  ;;  %vm1934_vm12 = vweird.f32 %v2564_v21  ;;  %v1961_v42 = vmul.f32 %v3543_v58, %v1823_v16 }
0x119e   :  { %v1944_v25 = vmul.f32 %v2566_v7, %v1912_v9  ;;  %vm1935_vm10 = vmor %vm1933_vm9, %vm1934_vm12  ;;  %vm1949_vm2 = vweird.f32 %v2566_v7  ;;  %vm2185_vm9 = vcmask 7168  }
0x119f   :  { %v1930_v27 = vsub.f32 1.0, %v1929_v44  ;;  %vm1950_vm14 = vmor %vm1948_vm13, %vm1949_vm2  ;;  %v2038_v44 = vld [vmem:[%s3660_s8 + $0x8] sm:$0xff] }
0x11a0   :  { %v1945_v50 = vsub.f32 1.0, %v1944_v25 }
0x11a1   :  { %v1931_v4 = vmul.f32 %v2564_v21, %v1930_v27  ;;  %v2037_v27 = vld [vmem:[%s3660_s8] sm:$0xff] }
0x11a2   :  { %v1946_v31 = vmul.f32 %v2566_v7, %v1945_v50  ;;  %v2133_v50 = vld [vmem:[%s3662_s12 + $0x10] sm:$0xff] }
0x11a3   :  { %v1932_v28 = vadd.f32 %v2564_v21, %v1931_v4 }
0x11a4   :  { %v1947_v10 = vadd.f32 %v2566_v7, %v1946_v31 }
0x11a5   :  { %v1936_v17 = vsel %vm1935_vm10, %v2564_v21, %v1932_v28  ;;  %v2042_v21 = vld [vmem:[%s3658_s9 + $0x8] sm:$0xff]  ;;  %v2134_v28 = vld [vmem:[%s3662_s12 + $0x18] sm:$0xff]  ;;  %vm2187_vm10 = vcmask 15360  }
0x11a6   :  { %v3551_v34 = vsel %vm1938_vm15, %v1940_v32, %v1936_v17  ;;  %v1951_v12 = vsel %vm1950_vm14, %v2566_v7, %v1947_v10  ;;  %2064 = vmatpush.msrb.mxu3 %v2042_v21  ;;  %v19_v17 = vstv %s3663_s13 }
0x11a7   :  { %v1956_v15 = vsel %vm1953_vm1, %v1955_v14, %v1951_v12  ;;  %v1962_v1 = vmul.f32 %v3551_v34, %v1824_v53  ;;  %20 = vst [vmem:[#allocation3] sm:$0x1] %v19_v17 }
0x11a8   :  { %v1963_v46 = vmul.f32 %v1956_v15, %v1825_v60 }
0x11ae   :  { %v2380_v12 = vld [vmem:[#allocation3] ss:$0 sm:$0xff] }
0x11d2   :  { %v1968_v6 = vpop.permute.xlu2 %1967 }
0x11d3   :  { %v1976_v49 = vmul.f32 %v1968_v6, %v3543_v58 }
0x11d5   :  { %1982 = vrot.lane.b32.xlu2 %v1976_v49, %s2580_s15 }
0x11dd   :  { %2026 = vperm.xlu2 %2376, %v2020_v57  }
0x11f3   :  { %v1970_v33 = vpop.permute.xlu1 %1969 }
0x11f4   :  { %v1977_v5 = vmul.f32 %v1970_v33, %v3551_v34 }
0x11f6   :  { %1984 = vrot.lane.b32.xlu1 %v1977_v5, %s2580_s15 }
0x11fb   :  { %v1972_v40 = vpop.permute.xlu0 %1971 }
0x11fc   :  { %v1978_v41 = vmul.f32 %v1972_v40, %v1956_v15 }
0x11fe   :  { %1986 = vrot.lane.b32.xlu0 %v1978_v41, %s2580_s15 }
0x122f   :  { %v1983_v43 = vpop.permute.xlu2 %1982 }
0x1230   :  { %v1991_v3 = vadd.f32 %v1983_v43, %v1961_v42 }
0x1232   :  { %2567 = vtanh.f32 %v1991_v3 }
0x1237   :  { %v2027_v48 = vpop.permute.xlu2 %2026 }
0x1238   :  { %v2568_v8 = vpop.eup %2567  ;;  %vm2032_vm7 = vcmp.eq.s32.totalorder %v2027_v48, 1 }
0x1239   :  { %2000 = vrot.lane.b32.xlu0 %v2568_v8, %s2580_s15 }
0x1241   :  { %2029 = vperm.xlu0 %2375, %v2021_v20  }
0x1268   :  { %v1985_v35 = vpop.permute.xlu1 %1984 }
0x1269   :  { %v1992_v54 = vadd.f32 %v1985_v35, %v1962_v1 }
0x126b   :  { %2569 = vtanh.f32 %v1992_v54 }
0x1270   :  { %v1987_v13 = vpop.permute.xlu0 %1986 }
0x1271   :  { %v2570_v61 = vpop.eup %2569  ;;  %v1993_v19 = vadd.f32 %v1987_v13, %v1963_v46 }
0x1272   :  { %2002 = vrot.lane.b32.xlu1 %v2570_v61, %s2580_s15 }
0x1273   :  { %2571 = vtanh.f32 %v1993_v19 }
0x1279   :  { %v2572_v51 = vpop.eup %2571 }
0x127a   :  { %2023 = vperm.xlu1 %2374, %v2019_v52   ;;  %2004 = vrot.lane.b32.xlu2 %v2572_v51, %s2580_s15 }
0x12ab   :  { %v2001_v23 = vpop.permute.xlu0 %2000 }
0x12ac   :  { %v2009_v39 = vmul.f32 %v2001_v23, %v3543_v58  ;;  %v2039_v58 = vld [vmem:[%s3660_s8 + $0x10] sm:$0xff] }
0x12b3   :  { %v2030_v2 = vpop.permute.xlu0 %2029 }
0x12b4   :  { %vm2033_vm4 = vcmp.eq.s32.totalorder %v2030_v2, 1 }
0x12d4   :  { %v2005_v56 = vpop.permute.xlu2 %2004 }
0x12d5   :  { %v2011_v26 = vmul.f32 %v2005_v56, %v1956_v15 }
0x12d7   :  { %v2036_v6 = vsel %vm2033_vm4, %v2011_v26, %v3512_v47  ;;  %v2095_v47 = vld [vmem:[%s3659_s10] sm:$0xff] }
0x12d8   :  { %2100 = vrot.lane.b32.xlu0 %v2036_v6, %s2582_s22  ;;  %2119 = vmatpush.msra.mxu0 %v2095_v47 }
0x12e4   :  { %v2003_v63 = vpop.permute.xlu1 %2002 }
0x12e5   :  { %v2010_v49 = vmul.f32 %v2003_v63, %v3551_v34  ;;  %v2379_v34 = vld [vmem:[%s3661_s11] ss:$0 sm:$0xff]  ;;  %s2584_s11 = smov 1  }
0x12e7   :  { %v2035_v22 = vsel %vm2032_vm7, %v2010_v49, %v3518_v55  ;;  %v2041_v55 = vld [vmem:[%s3658_s9] sm:$0xff] }
0x12e8   :  { %2046 = vrot.lane.b32.xlu1 %v2035_v22, %s2582_s22  ;;  %2065 = vmatpush.msrb.mxu3 %v2041_v55 }
0x12ec   :  { %v2024_v57 = vpop.permute.xlu1 %2023 }
0x12ed   :  { %vm2031_vm5 = vcmp.eq.s32.totalorder %v2024_v57, 1 }
0x12ee   :  { %v2034_v9 = vsel %vm2031_vm5, %v2009_v39, %v3497_v59  ;;  %v2040_v59 = vld [vmem:[%s3660_s8 + $0x18] sm:$0xff] }
0x12ef   :  { %2071 = vrot.lane.b32.xlu2 %v2034_v9, %s2582_s22  ;;  %2087 = vmatpush.msra.mxu3 %v2040_v59 }
0x12f1   :  { %2088 = vmatpush.msra.mxu3 %v2039_v58 }
0x12f3   :  { %2089 = vmatpush.msra.mxu3 %v2038_v44 }
0x12f5   :  { %2090 = vmatpush.msra.mxu3 %v2037_v27 }
0x1349   :  { %v2072_v25 = vpop.permute.xlu2 %2071 }
0x134a   :  { %v2101_v7 = vpop.permute.xlu0 %2100 }
0x134b   :  { %2345 = vmatmul.msk.f32.vlgmr.msra.gmra.mxu0 %vm232_vm0, %v2101_v7 }
0x135a   :  { %v2047_v4 = vpop.permute.xlu1 %2046 }
0x135b   :  { %2343 = vmatmul.msk.f32.vlgmr.msrb.gmra.mxu3 %vm232_vm0, %v2047_v4 }
0x135c   :  { %2154 = vmatpush.msrb.mxu3 %v2134_v28 }
0x135e   :  { %2155 = vmatpush.msrb.mxu3 %v2133_v50 }
0x1360   :  { %2156 = vmatpush.msrb.mxu3 %v2132_v29 }
0x1362   :  { %2157 = vmatpush.msrb.mxu3 %v2131_v30 }
0x1363   :  { %2344 = vmatmul.msk.f32.vlgmr.msra.gmra.mxu3 %vm232_vm0, %v2072_v25 }
0x13c8   :  { %v2121_v5 = vpop.f32.mrf.mxu0 }
0x13de   :  { %v2067_v31 = vpop.f32.mrf.mxu3 }
0x13e6   :  { %v2092_v32 = vpop.f32.mrf.mxu3 }
0x13e7   :  { %v2093_v33 = vadd.f32 %v2092_v32, %v2067_v31 }
0x13e9   :  { %v2124_v10 = vadd.f32 %v2121_v5, %v2093_v33 }
0x13eb   :  { %v2129_v36 = vadd.f32 %v2379_v34, %v2124_v10 }
0x13ed   :  { %v2130_v38 = vmax.f32 %v2129_v36, 0.0 }
0x13ef   :  { %2346 = vmatmul.msk.f32.vlgmr.msrb.gmra.mxu3 %vm232_vm0, %v2130_v38 }
0x1472   :  { %v2159_v14 = vpop.f32.mrf.mxu3 }
0x1473   :  { %v2160_v40 = vadd.f32 %v2380_v12, %v2159_v14 }
0x1475   :  { %v2347_v15 = vmul.f32 -1.442695, %v2160_v40 }
0x1477   :  { %2573 = vpow2.f32 %v2347_v15 }
0x147d   :  { %v2574_v41 = vpop.eup %2573 }
0x147e   :  { %v2165_v16 = vadd.f32 1.0, %v2574_v41 }
0x1480   :  { %2575 = vrcp.f32 %v2165_v16  ;;  %v2177_v8 = vand.u32 2147483648, %v2165_v16  ;;  %v2175_v20 = vand.u32 2147483647, %v2165_v16  ;;  %vm2171_vm11 = vweird.f32 %v2165_v16 }
0x1482   :  { %v2178_v1 = vor.u32 1.1754944e-38, %v2177_v8  ;;  %vm2176_vm0 = vcmp.eq.f32.partialorder %v2175_v20, 8.507059e+37 }
0x1486   :  { %v2576_v42 = vpop.eup %2575 }
0x1487   :  { %v2167_v43 = vmul.f32 %v2576_v42, %v2165_v16  ;;  %vm2172_vm6 = vweird.f32 %v2576_v42 }
0x1488   :  { %vm2173_vm12 = vmor %vm2171_vm11, %vm2172_vm6 }
0x1489   :  { %v2168_v3 = vsub.f32 1.0, %v2167_v43 }
0x148b   :  { %v2169_v18 = vmul.f32 %v2576_v42, %v2168_v3 }
0x148d   :  { %v2170_v53 = vadd.f32 %v2576_v42, %v2169_v18 }
0x148f   :  { %v2174_v35 = vsel %vm2173_vm12, %v2576_v42, %v2170_v53 }
0x1490   :  { %v2179_v54 = vsel %vm2176_vm0, %v2178_v1, %v2174_v35 }
0x1491   :  { %2182 = vrot.lane.b32.xlu1 %v2179_v54, %s2584_s11 }
0x1503   :  { %v2183_v60 = vpop.permute.xlu1 %2182 }
0x1504   :  { %v2186_v46 = vsel %vm2185_vm9, %v2160_v40, %v2183_v60 }
0x1505   :  { %2188 = vst.msk [vmem:[%s3664_s14] sm:$0xff] %vm2187_vm10, %v2186_v46 }

</bundles_post_ra>
